<compile_context>
chip_gen: v5e
topology: v5e:2x2
jax: 0.10.0
libtpu: 0.0.40
codegen_flags: <defaults>
</compile_context>

<pallas_src>
import jax
import jax.numpy as jnp
import numpy as np
from jax.experimental import pallas as pl
from jax.experimental.pallas import tpu as pltpu

EPS = 1e-5


def _instance_norm(y, n_inv):
    # y: (H*W, C) f32.  One-pass stats: var = E[x^2] - mean^2 (clamped), biased var.
    mean = jnp.sum(y, axis=0, keepdims=True) * n_inv
    ex2 = jnp.sum(y * y, axis=0, keepdims=True) * n_inv
    var = jnp.maximum(ex2 - mean * mean, 0.0)
    return (y - mean) * jax.lax.rsqrt(var + EPS)


def _resnet_block_kernel(x_ref, w1_ref, w2_ref, o_ref):
    # x_ref block: (1, H, W, C) f32; w*_ref: (3, 3*C, C) bf16 (indexed by ky).
    x = x_ref[0]                                   # (H, W, C) f32
    H, W, C = x.shape
    n_inv = 1.0 / (H * W)
    xf = x.reshape(H * W, C)                       # layout-free when W % 8 == 0

    def conv3x3(inp_bf16, w_ref):
        # inp_bf16: (H, W, Cin) bf16; w_ref: (3, 3*Cin, Cout) bf16 -> (H*W, Cout) f32.
        cin = inp_bf16.shape[-1]
        cout = w_ref.shape[-1]
        zc = jnp.zeros((H, 1, cin), jnp.bfloat16)
        # W-shifted taps (kx = 0, 1, 2), fused along channels -> K = 3*Cin.
        x_l = jnp.concatenate([zc, inp_bf16[:, :W - 1, :]], axis=1)   # x[:, w-1]
        x_r = jnp.concatenate([inp_bf16[:, 1:, :], zc], axis=1)       # x[:, w+1]
        xw = jnp.concatenate([x_l, inp_bf16, x_r], axis=-1).reshape(H * W, 3 * cin)
        # ky = 1 (center rows): full matmul.
        acc = jnp.dot(xw, w_ref[1], preferred_element_type=jnp.float32)
        # ky = 0: input rows [0, (H-1)*W) feed output rows [W, H*W).
        top = jnp.dot(xw[:(H - 1) * W], w_ref[0], preferred_element_type=jnp.float32)
        # ky = 2: input rows [W, H*W) feed output rows [0, (H-1)*W).
        bot = jnp.dot(xw[W:], w_ref[2], preferred_element_type=jnp.float32)
        # Zero-pad the narrow f32 results (output side) instead of the wide bf16 operand.
        zr = jnp.zeros((W, cout), jnp.float32)
        acc = acc + jnp.concatenate([zr, top], axis=0) \
                  + jnp.concatenate([bot, zr], axis=0)
        return acc

    # conv1 -> IN -> ReLU   (bias omitted: cancelled exactly by IN mean subtraction)
    h1 = jnp.maximum(_instance_norm(conv3x3(x.astype(jnp.bfloat16), w1_ref), n_inv), 0.0)
    # conv2 -> IN  (cast to bf16 once, right after ReLU, so all shift-building is half width)
    h2 = _instance_norm(conv3x3(h1.astype(jnp.bfloat16).reshape(H, W, C), w2_ref), n_inv)
    # residual add (f32)
    o_ref[0] = (xf + h2).reshape(H, W, C)


def resnet_block_nhwc(x_nhwc, params):
    """x_nhwc: (N, H, W, C) f32.  params = (w1, b1, w2, b2) in torch (O, I, 3, 3) layout.
    b1/b2 are accepted but not used by the kernel (exactly cancelled by affine=False IN)."""
    w1, _b1, w2, _b2 = params
    N, H, W, C = x_nhwc.shape

    # Repack conv weights: (O, I, ky, kx) -> (ky, kx*I, O), bf16 for the MXU.
    def repack(w):
        return jnp.transpose(w, (2, 3, 1, 0)).reshape(3, 3 * C, C).astype(jnp.bfloat16)

    w1_k = repack(w1)
    w2_k = repack(w2)

    grid_spec = pltpu.PrefetchScalarGridSpec(
        num_scalar_prefetch=0,
        grid=(N,),
        in_specs=[
            pl.BlockSpec((1, H, W, C), lambda n: (n, 0, 0, 0)),
            pl.BlockSpec((3, 3 * C, C), lambda n: (0, 0, 0)),   # constant block: no re-DMA
            pl.BlockSpec((3, 3 * C, C), lambda n: (0, 0, 0)),
        ],
        out_specs=pl.BlockSpec((1, H, W, C), lambda n: (n, 0, 0, 0)),
    )

    # Advisory cost hint for XLA's scheduler (2 convs, 9*C^2 MACs per pixel).
    flops = 2 * 2 * 9 * N * H * W * C * C
    bytes_accessed = 2 * N * H * W * C * 4 + 2 * 9 * C * C * 2

    return pl.pallas_call(
        _resnet_block_kernel,
        out_shape=jax.ShapeDtypeStruct((N, H, W, C), jnp.float32),
        grid_spec=grid_spec,
        compiler_params=pltpu.CompilerParams(
            dimension_semantics=("parallel",),
            # Raise the scoped-VMEM limit above the 16/32 MiB defaults (v5e/v6e) while
            # staying under v7x's 64 MiB physical budget.
            vmem_limit_bytes=48 * 1024 * 1024,
        ),
        cost_estimate=pl.CostEstimate(
            flops=flops, transcendentals=0, bytes_accessed=bytes_accessed),
    )(x_nhwc.astype(jnp.float32), w1_k, w2_k)


def resnet_block_nchw(x_nchw, params):
    """Convenience NCHW wrapper matching the PyTorch module interface."""
    x_nhwc = jnp.transpose(x_nchw, (0, 2, 3, 1))
    out = resnet_block_nhwc(x_nhwc, params)
    return jnp.transpose(out, (0, 3, 1, 2))


# --------------------- pure-JAX reference (NCHW, f32, like the PyTorch module) ------------
def _instance_norm_nchw(y):
    mean = jnp.mean(y, axis=(2, 3), keepdims=True)
    var = jnp.mean((y - mean) ** 2, axis=(2, 3), keepdims=True)
    return (y - mean) * jax.lax.rsqrt(var + EPS)


def reference_block(x, params):
    w1, b1, w2, b2 = params
    dn = ("NCHW", "OIHW", "NCHW")
    h = jax.lax.conv_general_dilated(x, w1, (1, 1), ((1, 1), (1, 1)), dimension_numbers=dn)
    h = h + b1[None, :, None, None]
    h = jnp.maximum(_instance_norm_nchw(h), 0.0)
    h = jax.lax.conv_general_dilated(h, w2, (1, 1), ((1, 1), (1, 1)), dimension_numbers=dn)
    h = h + b2[None, :, None, None]
    h = _instance_norm_nchw(h)
    return x + h


if __name__ == "__main__":
    key = jax.random.PRNGKey(0)
    N, C, H, W = 2, 8, 16, 16

    ks = jax.random.split(key, 5)
    x = jax.random.normal(ks[0], (N, C, H, W), jnp.float32)
    # Conv weights in PyTorch layout (out, in, kh, kw); deterministic init.
    w1 = jax.random.normal(ks[1], (C, C, 3, 3), jnp.float32) * 0.2
    b1 = jax.random.normal(ks[2], (C,), jnp.float32) * 0.1
    w2 = jax.random.normal(ks[3], (C, C, 3, 3), jnp.float32) * 0.2
    b2 = jax.random.normal(ks[4], (C,), jnp.float32) * 0.1
    params = (w1, b1, w2, b2)

    out = jax.block_until_ready(resnet_block_nchw(x, params))
    ref = jax.block_until_ready(reference_block(x, params))

    # Tolerance relaxed because the kernel uses bf16 MXU operands (f32 accumulation).
    if not np.allclose(np.asarray(out), np.asarray(ref), atol=5e-2, rtol=5e-2):
        diff = np.max(np.abs(np.asarray(out) - np.asarray(ref)))
        raise AssertionError(f"Pallas kernel output does not match reference (max diff {diff})")
    print("KERNEL_OK")
</pallas_src>

<mosaic_0001>
module attributes {stable_mosaic.version = 11 : i64} {
  func.func @_resnet_block_kernel(%arg0: i32, %arg1: memref<1x16x16x8xf32, #tpu.memory_space<vmem>>, %arg2: memref<3x24x8xbf16, #tpu.memory_space<vmem>>, %arg3: memref<3x24x8xbf16, #tpu.memory_space<vmem>>, %arg4: memref<1x16x16x8xf32, #tpu.memory_space<vmem>>) attributes {dimension_semantics = [#tpu.dimension_semantics<parallel>], iteration_bounds = array<i64: 2>, scalar_prefetch = 0 : i64, scratch_operands = 0 : i64, tpu.core_type = #tpu.core_type<tc>, window_params = [{transform_indices = @transform_0, window_bounds = array<i64: 1, 16, 16, 8>}, {pipeline_mode = #tpu.pipeline_mode<synchronous>, transform_indices = @transform_1, window_bounds = array<i64: 3, 24, 8>}, {pipeline_mode = #tpu.pipeline_mode<synchronous>, transform_indices = @transform_2, window_bounds = array<i64: 3, 24, 8>}, {transform_indices = @transform_3, window_bounds = array<i64: 1, 16, 16, 8>}]} {
    %c0 = arith.constant 0 : index
    %c0_0 = arith.constant 0 : index
    %c0_1 = arith.constant 0 : index
    %c0_2 = arith.constant 0 : index
    %0 = vector.load %arg1[%c0, %c0_0, %c0_1, %c0_2] : memref<1x16x16x8xf32, #tpu.memory_space<vmem>>, vector<1x16x16x8xf32>
    %1 = vector.shape_cast %0 : vector<1x16x16x8xf32> to vector<16x16x8xf32>
    %2 = vector.shape_cast %1 : vector<16x16x8xf32> to vector<256x8xf32>
    %3 = arith.truncf %1 : vector<16x16x8xf32> to vector<16x16x8xbf16>
    %cst = arith.constant 0.000000e+00 : bf16
    %4 = vector.broadcast %cst : bf16 to vector<16x1x8xbf16>
    %5 = vector.extract_strided_slice %3 {offsets = [0, 0, 0], sizes = [16, 15, 8], strides = [1, 1, 1]} : vector<16x16x8xbf16> to vector<16x15x8xbf16>
    %6 = tpu.concatenate %4, %5 in 1 : vector<16x1x8xbf16>, vector<16x15x8xbf16> -> vector<16x16x8xbf16>
    %7 = vector.extract_strided_slice %3 {offsets = [0, 1, 0], sizes = [16, 15, 8], strides = [1, 1, 1]} : vector<16x16x8xbf16> to vector<16x15x8xbf16>
    %8 = tpu.concatenate %7, %4 in 1 : vector<16x15x8xbf16>, vector<16x1x8xbf16> -> vector<16x16x8xbf16>
    %9 = tpu.concatenate %6, %3, %8 in 2 : vector<16x16x8xbf16>, vector<16x16x8xbf16>, vector<16x16x8xbf16> -> vector<16x16x24xbf16>
    %10 = vector.shape_cast %9 : vector<16x16x24xbf16> to vector<256x24xbf16>
    %c1 = arith.constant 1 : index
    %c0_3 = arith.constant 0 : index
    %c0_4 = arith.constant 0 : index
    %11 = vector.load %arg2[%c1, %c0_3, %c0_4] : memref<3x24x8xbf16, #tpu.memory_space<vmem>>, vector<1x24x8xbf16>
    %12 = vector.shape_cast %11 : vector<1x24x8xbf16> to vector<24x8xbf16>
    %cst_5 = arith.constant dense<0.000000e+00> : vector<256x8xf32>
    %13 = tpu.matmul %10, %12, %cst_5 {dimension_numbers = #tpu.dot_dimension_numbers<[1], [0], [0], [1], [0, 0, 1, 1], [], []>} : vector<256x24xbf16>, vector<24x8xbf16>, vector<256x8xf32> -> vector<256x8xf32>
    %14 = vector.extract_strided_slice %10 {offsets = [0, 0], sizes = [240, 24], strides = [1, 1]} : vector<256x24xbf16> to vector<240x24xbf16>
    %c0_6 = arith.constant 0 : index
    %c0_7 = arith.constant 0 : index
    %c0_8 = arith.constant 0 : index
    %15 = vector.load %arg2[%c0_6, %c0_7, %c0_8] : memref<3x24x8xbf16, #tpu.memory_space<vmem>>, vector<1x24x8xbf16>
    %16 = vector.shape_cast %15 : vector<1x24x8xbf16> to vector<24x8xbf16>
    %cst_9 = arith.constant dense<0.000000e+00> : vector<240x8xf32>
    %17 = tpu.matmul %14, %16, %cst_9 {dimension_numbers = #tpu.dot_dimension_numbers<[1], [0], [0], [1], [0, 0, 1, 1], [], []>} : vector<240x24xbf16>, vector<24x8xbf16>, vector<240x8xf32> -> vector<240x8xf32>
    %18 = vector.extract_strided_slice %10 {offsets = [16, 0], sizes = [240, 24], strides = [1, 1]} : vector<256x24xbf16> to vector<240x24xbf16>
    %c2 = arith.constant 2 : index
    %c0_10 = arith.constant 0 : index
    %c0_11 = arith.constant 0 : index
    %19 = vector.load %arg2[%c2, %c0_10, %c0_11] : memref<3x24x8xbf16, #tpu.memory_space<vmem>>, vector<1x24x8xbf16>
    %20 = vector.shape_cast %19 : vector<1x24x8xbf16> to vector<24x8xbf16>
    %cst_12 = arith.constant dense<0.000000e+00> : vector<240x8xf32>
    %21 = tpu.matmul %18, %20, %cst_12 {dimension_numbers = #tpu.dot_dimension_numbers<[1], [0], [0], [1], [0, 0, 1, 1], [], []>} : vector<240x24xbf16>, vector<24x8xbf16>, vector<240x8xf32> -> vector<240x8xf32>
    %cst_13 = arith.constant 0.000000e+00 : f32
    %22 = vector.broadcast %cst_13 : f32 to vector<16x8xf32>
    %23 = tpu.concatenate %22, %17 in 0 : vector<16x8xf32>, vector<240x8xf32> -> vector<256x8xf32>
    %24 = arith.addf %13, %23 : vector<256x8xf32>
    %25 = tpu.concatenate %21, %22 in 0 : vector<240x8xf32>, vector<16x8xf32> -> vector<256x8xf32>
    %26 = arith.addf %24, %25 : vector<256x8xf32>
    %cst_14 = arith.constant dense<0.000000e+00> : vector<8xf32>
    %27 = vector.multi_reduction <add>, %26, %cst_14 [0] : vector<256x8xf32> to vector<8xf32>
    %28 = vector.shape_cast %27 : vector<8xf32> to vector<1x8xf32>
    %cst_15 = arith.constant 3.906250e-03 : f32
    %29 = vector.broadcast %cst_15 : f32 to vector<1x8xf32>
    %30 = arith.mulf %28, %29 : vector<1x8xf32>
    %31 = arith.mulf %26, %26 : vector<256x8xf32>
    %cst_16 = arith.constant dense<0.000000e+00> : vector<8xf32>
    %32 = vector.multi_reduction <add>, %31, %cst_16 [0] : vector<256x8xf32> to vector<8xf32>
    %33 = vector.shape_cast %32 : vector<8xf32> to vector<1x8xf32>
    %cst_17 = arith.constant 3.906250e-03 : f32
    %34 = vector.broadcast %cst_17 : f32 to vector<1x8xf32>
    %35 = arith.mulf %33, %34 : vector<1x8xf32>
    %36 = arith.mulf %30, %30 : vector<1x8xf32>
    %37 = arith.subf %35, %36 : vector<1x8xf32>
    %cst_18 = arith.constant 0.000000e+00 : f32
    %38 = vector.broadcast %cst_18 : f32 to vector<1x8xf32>
    %39 = arith.maximumf %37, %38 : vector<1x8xf32>
    %40 = vector.broadcast %30 : vector<1x8xf32> to vector<256x8xf32>
    %41 = arith.subf %26, %40 : vector<256x8xf32>
    %cst_19 = arith.constant 9.99999974E-6 : f32
    %42 = vector.broadcast %cst_19 : f32 to vector<1x8xf32>
    %43 = arith.addf %39, %42 : vector<1x8xf32>
    %44 = math.rsqrt %43 : vector<1x8xf32>
    %45 = vector.broadcast %44 : vector<1x8xf32> to vector<256x8xf32>
    %46 = arith.mulf %41, %45 : vector<256x8xf32>
    %cst_20 = arith.constant 0.000000e+00 : f32
    %47 = vector.broadcast %cst_20 : f32 to vector<256x8xf32>
    %48 = arith.maximumf %46, %47 : vector<256x8xf32>
    %49 = arith.truncf %48 : vector<256x8xf32> to vector<256x8xbf16>
    %50 = vector.shape_cast %49 : vector<256x8xbf16> to vector<16x16x8xbf16>
    %cst_21 = arith.constant 0.000000e+00 : bf16
    %51 = vector.broadcast %cst_21 : bf16 to vector<16x1x8xbf16>
    %52 = vector.extract_strided_slice %50 {offsets = [0, 0, 0], sizes = [16, 15, 8], strides = [1, 1, 1]} : vector<16x16x8xbf16> to vector<16x15x8xbf16>
    %53 = tpu.concatenate %51, %52 in 1 : vector<16x1x8xbf16>, vector<16x15x8xbf16> -> vector<16x16x8xbf16>
    %54 = vector.extract_strided_slice %50 {offsets = [0, 1, 0], sizes = [16, 15, 8], strides = [1, 1, 1]} : vector<16x16x8xbf16> to vector<16x15x8xbf16>
    %55 = tpu.concatenate %54, %51 in 1 : vector<16x15x8xbf16>, vector<16x1x8xbf16> -> vector<16x16x8xbf16>
    %56 = tpu.concatenate %53, %50, %55 in 2 : vector<16x16x8xbf16>, vector<16x16x8xbf16>, vector<16x16x8xbf16> -> vector<16x16x24xbf16>
    %57 = vector.shape_cast %56 : vector<16x16x24xbf16> to vector<256x24xbf16>
    %c1_22 = arith.constant 1 : index
    %c0_23 = arith.constant 0 : index
    %c0_24 = arith.constant 0 : index
    %58 = vector.load %arg3[%c1_22, %c0_23, %c0_24] : memref<3x24x8xbf16, #tpu.memory_space<vmem>>, vector<1x24x8xbf16>
    %59 = vector.shape_cast %58 : vector<1x24x8xbf16> to vector<24x8xbf16>
    %cst_25 = arith.constant dense<0.000000e+00> : vector<256x8xf32>
    %60 = tpu.matmul %57, %59, %cst_25 {dimension_numbers = #tpu.dot_dimension_numbers<[1], [0], [0], [1], [0, 0, 1, 1], [], []>} : vector<256x24xbf16>, vector<24x8xbf16>, vector<256x8xf32> -> vector<256x8xf32>
    %61 = vector.extract_strided_slice %57 {offsets = [0, 0], sizes = [240, 24], strides = [1, 1]} : vector<256x24xbf16> to vector<240x24xbf16>
    %c0_26 = arith.constant 0 : index
    %c0_27 = arith.constant 0 : index
    %c0_28 = arith.constant 0 : index
    %62 = vector.load %arg3[%c0_26, %c0_27, %c0_28] : memref<3x24x8xbf16, #tpu.memory_space<vmem>>, vector<1x24x8xbf16>
    %63 = vector.shape_cast %62 : vector<1x24x8xbf16> to vector<24x8xbf16>
    %cst_29 = arith.constant dense<0.000000e+00> : vector<240x8xf32>
    %64 = tpu.matmul %61, %63, %cst_29 {dimension_numbers = #tpu.dot_dimension_numbers<[1], [0], [0], [1], [0, 0, 1, 1], [], []>} : vector<240x24xbf16>, vector<24x8xbf16>, vector<240x8xf32> -> vector<240x8xf32>
    %65 = vector.extract_strided_slice %57 {offsets = [16, 0], sizes = [240, 24], strides = [1, 1]} : vector<256x24xbf16> to vector<240x24xbf16>
    %c2_30 = arith.constant 2 : index
    %c0_31 = arith.constant 0 : index
    %c0_32 = arith.constant 0 : index
    %66 = vector.load %arg3[%c2_30, %c0_31, %c0_32] : memref<3x24x8xbf16, #tpu.memory_space<vmem>>, vector<1x24x8xbf16>
    %67 = vector.shape_cast %66 : vector<1x24x8xbf16> to vector<24x8xbf16>
    %cst_33 = arith.constant dense<0.000000e+00> : vector<240x8xf32>
    %68 = tpu.matmul %65, %67, %cst_33 {dimension_numbers = #tpu.dot_dimension_numbers<[1], [0], [0], [1], [0, 0, 1, 1], [], []>} : vector<240x24xbf16>, vector<24x8xbf16>, vector<240x8xf32> -> vector<240x8xf32>
    %cst_34 = arith.constant 0.000000e+00 : f32
    %69 = vector.broadcast %cst_34 : f32 to vector<16x8xf32>
    %70 = tpu.concatenate %69, %64 in 0 : vector<16x8xf32>, vector<240x8xf32> -> vector<256x8xf32>
    %71 = arith.addf %60, %70 : vector<256x8xf32>
    %72 = tpu.concatenate %68, %69 in 0 : vector<240x8xf32>, vector<16x8xf32> -> vector<256x8xf32>
    %73 = arith.addf %71, %72 : vector<256x8xf32>
    %cst_35 = arith.constant dense<0.000000e+00> : vector<8xf32>
    %74 = vector.multi_reduction <add>, %73, %cst_35 [0] : vector<256x8xf32> to vector<8xf32>
    %75 = vector.shape_cast %74 : vector<8xf32> to vector<1x8xf32>
    %cst_36 = arith.constant 3.906250e-03 : f32
    %76 = vector.broadcast %cst_36 : f32 to vector<1x8xf32>
    %77 = arith.mulf %75, %76 : vector<1x8xf32>
    %78 = arith.mulf %73, %73 : vector<256x8xf32>
    %cst_37 = arith.constant dense<0.000000e+00> : vector<8xf32>
    %79 = vector.multi_reduction <add>, %78, %cst_37 [0] : vector<256x8xf32> to vector<8xf32>
    %80 = vector.shape_cast %79 : vector<8xf32> to vector<1x8xf32>
    %cst_38 = arith.constant 3.906250e-03 : f32
    %81 = vector.broadcast %cst_38 : f32 to vector<1x8xf32>
    %82 = arith.mulf %80, %81 : vector<1x8xf32>
    %83 = arith.mulf %77, %77 : vector<1x8xf32>
    %84 = arith.subf %82, %83 : vector<1x8xf32>
    %cst_39 = arith.constant 0.000000e+00 : f32
    %85 = vector.broadcast %cst_39 : f32 to vector<1x8xf32>
    %86 = arith.maximumf %84, %85 : vector<1x8xf32>
    %87 = vector.broadcast %77 : vector<1x8xf32> to vector<256x8xf32>
    %88 = arith.subf %73, %87 : vector<256x8xf32>
    %cst_40 = arith.constant 9.99999974E-6 : f32
    %89 = vector.broadcast %cst_40 : f32 to vector<1x8xf32>
    %90 = arith.addf %86, %89 : vector<1x8xf32>
    %91 = math.rsqrt %90 : vector<1x8xf32>
    %92 = vector.broadcast %91 : vector<1x8xf32> to vector<256x8xf32>
    %93 = arith.mulf %88, %92 : vector<256x8xf32>
    %94 = arith.addf %2, %93 : vector<256x8xf32>
    %95 = vector.shape_cast %94 : vector<256x8xf32> to vector<16x16x8xf32>
    %c0_41 = arith.constant 0 : index
    %c0_42 = arith.constant 0 : index
    %c0_43 = arith.constant 0 : index
    %c0_44 = arith.constant 0 : index
    %96 = vector.load %arg4[%c0_41, %c0_42, %c0_43, %c0_44] : memref<1x16x16x8xf32, #tpu.memory_space<vmem>>, vector<1x16x16x8xf32>
    %97 = vector.shape_cast %96 : vector<1x16x16x8xf32> to vector<16x16x8xf32>
    %98 = vector.shape_cast %95 : vector<16x16x8xf32> to vector<1x16x16x8xf32>
    tpu.vector_store %arg4[%c0_41, %c0_42, %c0_43, %c0_44], %98 {strides = array<i32>} : memref<1x16x16x8xf32, #tpu.memory_space<vmem>>, vector<1x16x16x8xf32>,
    return
  }
  func.func @transform_0(%arg0: i32) -> (i32, i32, i32, i32) {
    %c0_i32 = arith.constant 0 : i32
    %c0_i32_0 = arith.constant 0 : i32
    %c0_i32_1 = arith.constant 0 : i32
    %c0_i32_2 = arith.constant 0 : i32
    return %arg0, %c0_i32, %c0_i32_0, %c0_i32_1 : i32, i32, i32, i32
  }
  func.func @transform_1(%arg0: i32) -> (i32, i32, i32) {
    %c0_i32 = arith.constant 0 : i32
    %c0_i32_0 = arith.constant 0 : i32
    %c0_i32_1 = arith.constant 0 : i32
    %c0_i32_2 = arith.constant 0 : i32
    return %c0_i32, %c0_i32_0, %c0_i32_1 : i32, i32, i32
  }
  func.func @transform_2(%arg0: i32) -> (i32, i32, i32) {
    %c0_i32 = arith.constant 0 : i32
    %c0_i32_0 = arith.constant 0 : i32
    %c0_i32_1 = arith.constant 0 : i32
    %c0_i32_2 = arith.constant 0 : i32
    return %c0_i32, %c0_i32_0, %c0_i32_1 : i32, i32, i32
  }
  func.func @transform_3(%arg0: i32) -> (i32, i32, i32, i32) {
    %c0_i32 = arith.constant 0 : i32
    %c0_i32_0 = arith.constant 0 : i32
    %c0_i32_1 = arith.constant 0 : i32
    %c0_i32_2 = arith.constant 0 : i32
    return %arg0, %c0_i32, %c0_i32_0, %c0_i32_1 : i32, i32, i32, i32
  }
}

</mosaic_0001>

<bundles_post_ra>
// kernel: tpu_custom_call.1
= control target key start
LH: loop header
LB: loop body
LE: loop exit
PB: predicated region body
PF: predicated region fallthrough
CT: control target
= control target key end

     0   :  { %s2788_s12 = smov 0   ;;  %s4704_s0 = inlined_call_operand.vmem [shape: f32[2,16,16,8], index: 0, kind: input, shape index: {}]   ;;  %s4705_s1 = inlined_call_operand.vmem [shape: bf16[3,24,8], index: 1, kind: input, shape index: {}]   ;;  %s4706_s2 = inlined_call_operand.vmem [shape: bf16[3,24,8], index: 2, kind: input, shape index: {}]   ;;  %s4707_s3 = inlined_call_operand.vmem [shape: f32[2,16,16,8], index: 3, kind: output, shape index: {}]  }
   0x1 LB: > { %s2561_s13 = sadd.s32 4294967295, %s2764_s12   ;;  %p2565_p0 = scmp.ge.s32.totalorder %s2764_s12, 1  ;;  %s2764_s12 = sphi %s2788_s12, %s13_s12  }
   0x2   : > { %p137_p1 = scmp.lt.s32.totalorder %s2764_s12, 3 }
   0x4   : > { %p138_p2 = pnand %p2565_p0, %p137_p1 }
   0x6   : > { %141 = sbr.rel (%p138_p2) target bundleno = 1275 (0x4fb), region = 32 }
   0xb   : > { %p161_p3 = scmp.lt.s32.totalorder %s2561_s13, 1  ;;  %vm511_vm0 = vcmask 1047552   ;;  %s2766_s18 = smov 8   ;;  %vm512_vm1 = vsmask.f32 7424  ;;  %v4716_v42 = vmov 0 }
   0xc   : > { %vm2840_vm2 = vmand %vm511_vm0, %vm512_vm1  ;;  %s2767_s19 = smov 16   ;;  %vm739_vm3 = vcmask 1043456   ;;  %vm444_vm4 = vcmask 1040384   ;;  %vm445_vm5 = vsmask.f32 256  ;;  %vm610_vm7 = vcmask 64512  }
   0xd   : > { %s4759_s13 = smov (!%p161_p3, %s2561_s13), 1  ;;  %v4717_v42 = vsel %vm2840_vm2, 4294967295, %v4716_v42  ;;  %vm2985_vm6 = vmand %vm444_vm4, %vm445_vm5  ;;  %vm659_vm8 = vcmask 130048   ;;  %vm708_vm9 = vcmask 195584  }
   0xe   : > { %s2700_s14 = sshll.u32 %s4759_s13, 8  ;;  %4718 = vst [vmem:[#allocation2_spill] sm:$0xff] %v4717_v42 }
   0xf   : > { %s2804_s17 = scalar_lea.vmem %s4704_s0, %s2700_s14  ;;  %s4526_s23 = scalar_lea.vmem %s4707_s3, %s2700_s14 }
  0x10   : > { %v188_v0 = vld [vmem:[%s2804_s17 + $0x80] sm:$0xff]  ;;  %v189_v1 = vld [vmem:[%s2804_s17 + $0x88] sm:$0xff]  ;;  %v190_v2 = vld [vmem:[%s2804_s17 + $0x90] sm:$0xff] }
  0x11   : > { %v220_v3 = vpack.c.bf16 %v188_v0, %v188_v0  ;;  %v221_v4 = vpack.c.bf16 %v189_v1, %v189_v1  ;;  %v191_v5 = vld [vmem:[%s2804_s17 + $0x98] sm:$0xff]  ;;  %v222_v6 = vpack.c.bf16 %v190_v2, %v190_v2  ;;  %v192_v7 = vld [vmem:[%s2804_s17 + $0xa0] sm:$0xff]  ;;  %v193_v8 = vld [vmem:[%s2804_s17 + $0xa8] sm:$0xff] }
  0x12   : > { %v223_v9 = vpack.c.bf16 %v191_v5, %v191_v5  ;;  %v224_v10 = vpack.c.bf16 %v192_v7, %v192_v7  ;;  %v225_v11 = vpack.c.bf16 %v193_v8, %v193_v8  ;;  %v194_v12 = vld [vmem:[%s2804_s17 + $0xb0] sm:$0xff]  ;;  %v195_v13 = vld [vmem:[%s2804_s17 + $0xb8] sm:$0xff]  ;;  %v196_v14 = vld [vmem:[%s2804_s17 + $0xc0] sm:$0xff] }
  0x13   : > { %v284_v15 = vunpack.c.l.b16 %v220_v3  ;;  %v285_v16 = vunpack.c.l.b16 %v221_v4  ;;  %v286_v17 = vunpack.c.l.b16 %v222_v6  ;;  %v226_v18 = vpack.c.bf16 %v194_v12, %v194_v12  ;;  %v197_v19 = vld [vmem:[%s2804_s17 + $0xc8] sm:$0xff]  ;;  %v198_v34 = vld [vmem:[%s2804_s17 + $0xd0] sm:$0xff]  ;;  %v199_v45 = vld [vmem:[%s2804_s17 + $0xd8] sm:$0xff] }
  0x14   : > { %v287_v20 = vunpack.c.l.b16 %v223_v9  ;;  %v288_v21 = vunpack.c.l.b16 %v224_v10  ;;  %v289_v22 = vunpack.c.l.b16 %v225_v11  ;;  %v227_v23 = vpack.c.bf16 %v195_v13, %v195_v13  ;;  %v200_v52 = vld [vmem:[%s2804_s17 + $0xe0] sm:$0xff]  ;;  %v201_v53 = vld [vmem:[%s2804_s17 + $0xe8] sm:$0xff] }
  0x15   : > { %v2816_v24 = vpack.c.b16 %v285_v16, %v284_v15  ;;  %v290_v25 = vunpack.c.l.b16 %v226_v18  ;;  %v228_v26 = vpack.c.bf16 %v196_v14, %v196_v14  ;;  %v229_v27 = vpack.c.bf16 %v197_v19, %v197_v19  ;;  %v172_v5 = vld [vmem:[%s2804_s17] sm:$0xff]  ;;  %v173_v6 = vld [vmem:[%s2804_s17 + $0x8] sm:$0xff] }
  0x16   : > { %v2818_v28 = vpack.c.b16 %v287_v20, %v286_v17  ;;  %v2820_v29 = vpack.c.b16 %v289_v22, %v288_v21  ;;  %v291_v30 = vunpack.c.l.b16 %v227_v23  ;;  %v230_v46 = vpack.c.bf16 %v198_v34, %v198_v34 }
  0x17   : > { %546 = vrot.lane.b32.xlu0 %v2816_v24, %s2766_s18  ;;  %v373_v31 = vshrl.u32 %v2816_v24, 16  ;;  %v376_v32 = vshll.u32 %v2816_v24, 16  ;;  %v292_v33 = vunpack.c.l.b16 %v228_v26  ;;  %v293_v38 = vunpack.c.l.b16 %v229_v27 }
  0x18   : > { %548 = vrot.lane.b32.xlu1 %v2818_v28, %s2766_s18  ;;  %v380_v35 = vshrl.u32 %v2818_v28, 16  ;;  %v383_v36 = vshll.u32 %v2818_v28, 16  ;;  %550 = vrot.lane.b32.xlu2 %v2820_v29, %s2766_s18  ;;  %v2833_v37 = vpack.c.b16 %v291_v30, %v290_v25  ;;  %v387_v40 = vshrl.u32 %v2820_v29, 16  ;;  %v2702_v28 = vld [vmem:[%s4705_s1 + $0xc] sm:$0xff] }
  0x19   : > { %v479_v39 = vrot.slane %v376_v32, 1  ;;  %v390_v41 = vshll.u32 %v2820_v29, 16  ;;  %v2855_v51 = vpack.c.b16 %v293_v38, %v292_v33  ;;  %v231_v57 = vpack.c.bf16 %v199_v45, %v199_v45  ;;  %v698_v45 = vld [vmem:[%s4705_s1 + $0x8] sm:$0xf] }
  0x1a   : > { %v481_v43 = vrot.slane %v383_v36, 1  ;;  %v397_v44 = vshll.u32 %v2833_v37, 16  ;;  %v394_v50 = vshrl.u32 %v2833_v37, 16  ;;  %v294_v59 = vunpack.c.l.b16 %v230_v46  ;;  %v2594_v46 = vld [vmem:[%s4705_s1 + $0x20] sm:$0xf] }
  0x1b   : > { %v480_v47 = vor.u32 %v479_v39, %v373_v31  ;;  %v483_v48 = vrot.slane %v390_v41, 1  ;;  %v295_v61 = vunpack.c.l.b16 %v231_v57  ;;  %v232_v62 = vpack.c.bf16 %v200_v52, %v200_v52  ;;  %v174_v57 = vld [vmem:[%s2804_s17 + $0x10] sm:$0xff] }
  0x1c   : > { %v482_v49 = vor.u32 %v481_v43, %v380_v35  ;;  %v485_v55 = vrot.slane %v397_v44, 1  ;;  %v233_v63 = vpack.c.bf16 %v201_v53, %v201_v53  ;;  %v404_v0 = vshll.u32 %v2855_v51, 16 }
  0x1d   : > { %v522_v54 = vsel %vm2840_vm2, %v480_v47, 0  ;;  %v484_v56 = vor.u32 %v483_v48, %v387_v40  ;;  %v2875_v2 = vpack.c.b16 %v295_v61, %v294_v59  ;;  %v296_v3 = vunpack.c.l.b16 %v232_v62 }
  0x1e   : > { %v523_v58 = vsel %vm2840_vm2, %v482_v49, 0  ;;  %v486_v1 = vor.u32 %v485_v55, %v394_v50  ;;  %v297_v4 = vunpack.c.l.b16 %v233_v63  ;;  %v401_v8 = vshrl.u32 %v2855_v51, 16  ;;  %v2703_v55 = vld [vmem:[%s4705_s1] sm:$0xff] }
  0x1f   : > { %594 = vrot.lane.b32.xlu0 %v522_v54, %s2767_s19  ;;  %v524_v60 = vsel %vm2840_vm2, %v484_v56, 0  ;;  %v411_v7 = vshll.u32 %v2875_v2, 16  ;;  %v487_v9 = vrot.slane %v404_v0, 1  ;;  %v204_v10 = vpack.c.bf16 %v172_v5, %v172_v5  ;;  %v2704_v56 = vld [vmem:[%s4705_s1 + $0x18] sm:$0xff] }
  0x20   : > { %596 = vrot.lane.b32.xlu1 %v523_v58, %s2767_s19  ;;  %598 = vrot.lane.b32.xlu2 %v524_v60, %s2767_s19  ;;  %v205_v11 = vpack.c.bf16 %v173_v6, %v173_v6  ;;  %v525_v12 = vsel %vm2840_vm2, %v486_v1, 0  ;;  %v2885_v13 = vpack.c.b16 %v297_v4, %v296_v3  ;;  %v408_v14 = vshrl.u32 %v2875_v2, 16  ;;  %v175_v58 = vld [vmem:[%s2804_s17 + $0x18] sm:$0xff]  ;;  %v2572_v1 = vld [vmem:[%s4705_s1 + $0x14] sm:$0xf] }
  0x21   : > { %v489_v15 = vrot.slane %v411_v7, 1  ;;  %v488_v16 = vor.u32 %v487_v9, %v401_v8  ;;  %v268_v17 = vunpack.c.l.b16 %v204_v10  ;;  %v704_v47 = vunpack.c.l.b16 %v698_v45  ;;  %v176_v6 = vld [vmem:[%s2804_s17 + $0x20] sm:$0xff]  ;;  %v177_v9 = vld [vmem:[%s2804_s17 + $0x28] sm:$0xff] }
  0x22   : > { %v269_v18 = vunpack.c.l.b16 %v205_v11  ;;  %v418_v19 = vshll.u32 %v2885_v13, 16  ;;  %v415_v23 = vshrl.u32 %v2885_v13, 16  ;;  %v836_v48 = vunpack.c.l.b16 %v2594_v46  ;;  %v178_v46 = vld [vmem:[%s2804_s17 + $0x30] sm:$0xff] }
  0x23   : > { %v490_v20 = vor.u32 %v489_v15, %v408_v14  ;;  %v526_v21 = vsel %vm2840_vm2, %v488_v16, 0  ;;  %v706_v49 = vpack.c.b16 %v704_v47, %v704_v47  ;;  %v206_v59 = vpack.c.bf16 %v174_v57, %v174_v57  ;;  %v179_v47 = vld [vmem:[%s2804_s17 + $0x38] sm:$0xff] }
  0x24   : > { %v2902_v22 = vpack.c.b16 %v269_v18, %v268_v17  ;;  %v491_v25 = vrot.slane %v418_v19, 1  ;;  %v838_v52 = vpack.c.b16 %v836_v48, %v836_v48  ;;  %v207_v60 = vpack.c.bf16 %v175_v58, %v175_v58 }
  0x25   : > { %v527_v26 = vsel %vm2840_vm2, %v490_v20, 0  ;;  %v741_v53 = vsel %vm739_vm3, %v706_v49, 0  ;;  %v270_v61 = vunpack.c.l.b16 %v206_v59  ;;  %v934_v3 = vunpack.c.l.b16 %v2572_v1 }
  0x26   : > { %v320_v27 = vshll.u32 %v2902_v22, 16  ;;  %v492_v30 = vor.u32 %v491_v25, %v415_v23  ;;  %v317_v33 = vshrl.u32 %v2902_v22, 16  ;;  %v843_v54 = vsel %vm739_vm3, %v838_v52, 0  ;;  %2708 = vmatpush.bf16.msra.mxu2 %v741_v53  ;;  %749 = vmatpush.bf16.msra.mxu0 %v741_v53 }
  0x27   : > { %552 = vrot.lane.b32.xlu0 %v2833_v37, %s2766_s18  ;;  %2710 = vmatpush.bf16.msra.mxu3 %v843_v54  ;;  %v271_v62 = vunpack.c.l.b16 %v207_v60  ;;  %v936_v4 = vpack.c.b16 %v934_v3, %v934_v3  ;;  %v208_v10 = vpack.c.bf16 %v176_v6, %v176_v6  ;;  %v209_v11 = vpack.c.bf16 %v177_v9, %v177_v9 }
  0x28   : > { %600 = vrot.lane.b32.xlu1 %v525_v12, %s2767_s19  ;;  %554 = vrot.lane.b32.xlu2 %v2855_v51, %s2766_s18  ;;  %v463_v34 = vrot.slane %v320_v27, 1  ;;  %v528_v38 = vsel %vm2840_vm2, %v492_v30, 0  ;;  %v211_v49 = vpack.c.bf16 %v179_v47, %v179_v47  ;;  %v4719_v52 = vmov 0 }
  0x29   : > { %851 = vmatpush.bf16.msra.mxu1 %v843_v54  ;;  %v2947_v63 = vpack.c.b16 %v271_v62, %v270_v61  ;;  %v939_v5 = vsel %vm739_vm3, %v936_v4, 0  ;;  %v272_v12 = vunpack.c.l.b16 %v208_v10  ;;  %v273_v15 = vunpack.c.l.b16 %v209_v11  ;;  %v180_v10 = vld [vmem:[%s2804_s17 + $0x40] sm:$0xff] }
  0x2a   : > { %v464_v39 = vor.u32 %v463_v34, %v317_v33  ;;  %2709 = vmatpush.bf16.msra.mxu2 %v2703_v55  ;;  %750 = vmatpush.bf16.msra.mxu0 %v2703_v55  ;;  %v375_v34 = vrot.slane %v373_v31, 7  ;;  %v210_v31 = vpack.c.bf16 %v178_v46, %v178_v46  ;;  %v4720_v52 = vsel %vm2985_vm6, 4294967295, %v4719_v52 }
  0x2b   : > { %2711 = vmatpush.bf16.msra.mxu3 %v2704_v56  ;;  %v2957_v16 = vpack.c.b16 %v273_v15, %v272_v12  ;;  %v327_v25 = vshll.u32 %v2947_v63, 16  ;;  %4721 = vst [vmem:[#allocation3_spill] sm:$0xff] %v4720_v52  ;;  %v275_v54 = vunpack.c.l.b16 %v211_v49  ;;  %v382_v61 = vrot.slane %v380_v35, 7  ;;  %v181_v35 = vld [vmem:[%s2804_s17 + $0x48] sm:$0xff] }
  0x2c   : > { %v514_v43 = vsel %vm2840_vm2, %v464_v39, 0  ;;  %v378_v48 = vor.u32 %v376_v32, %v375_v34  ;;  %v274_v53 = vunpack.c.l.b16 %v210_v31  ;;  %v212_v11 = vpack.c.bf16 %v180_v10, %v180_v10 }
  0x2d   : > { %852 = vmatpush.bf16.msra.mxu1 %v2704_v56  ;;  %v334_v17 = vshll.u32 %v2957_v16, 16  ;;  %v331_v18 = vshrl.u32 %v2957_v16, 16  ;;  %v465_v30 = vrot.slane %v327_v25, 1  ;;  %v385_v4 = vor.u32 %v383_v36, %v382_v61 }
  0x2e   : > { %947 = vmatpush.bf16.msrb.mxu2 %v939_v5  ;;  %v455_v55 = vsel %vm2985_vm6, 0, %v378_v48  ;;  %v2991_v56 = vpack.c.b16 %v275_v54, %v274_v53  ;;  %v213_v12 = vpack.c.bf16 %v181_v35, %v181_v35  ;;  %v389_v36 = vrot.slane %v387_v40, 7 }
  0x2f   : > { %602 = vrot.lane.b32.xlu0 %v526_v21, %s2767_s19  ;;  %v467_v20 = vrot.slane %v334_v17, 1  ;;  %v324_v21 = vshrl.u32 %v2947_v63, 16  ;;  %v456_v5 = vsel %vm2985_vm6, 0, %v385_v4 }
  0x30   : > { %556 = vrot.lane.b32.xlu1 %v2875_v2, %s2766_s18  ;;  %604 = vrot.lane.b32.xlu2 %v527_v26, %s2767_s19  ;;  %v341_v24 = vshll.u32 %v2991_v56, 16  ;;  %v338_v59 = vshrl.u32 %v2991_v56, 16 }
  0x31   : > { %v468_v26 = vor.u32 %v467_v20, %v331_v18  ;;  %v466_v39 = vor.u32 %v465_v30, %v324_v21  ;;  %v276_v20 = vunpack.c.l.b16 %v212_v11  ;;  %v326_v2 = vrot.slane %v324_v21, 7 }
  0x32   : > { %v469_v60 = vrot.slane %v341_v24, 1  ;;  %948 = vmatpush.bf16.msrb.mxu2 %v2702_v28 }
  0x33   : > { %v515_v45 = vsel %vm2840_vm2, %v466_v39, 0  ;;  %v182_v39 = vld [vmem:[%s2804_s17 + $0x50] sm:$0xff] }
  0x34   : > { %v470_v62 = vor.u32 %v469_v60, %v338_v59 }
  0x36   : > { %v517_v3 = vsel %vm2840_vm2, %v470_v62, 0 }
  0x37   : > { %558 = vrot.lane.b32.xlu0 %v2885_v13, %s2766_s18 }
  0x38   : > { %606 = vrot.lane.b32.xlu1 %v528_v38, %s2767_s19  ;;  %530 = vrot.lane.b32.xlu2 %v2902_v22, %s2766_s18  ;;  %v516_v38 = vsel %vm2840_vm2, %v468_v26, 0  ;;  %v277_v26 = vunpack.c.l.b16 %v213_v12 }
  0x3a   : > { %v3033_v30 = vpack.c.b16 %v277_v26, %v276_v20 }
  0x3c   : > { %v348_v60 = vshll.u32 %v3033_v30, 16 }
  0x3e   : > { %v471_v61 = vrot.slane %v348_v60, 1 }
  0x3f   : > { %578 = vrot.lane.b32.xlu0 %v514_v43, %s2767_s19 }
  0x40   : > { %532 = vrot.lane.b32.xlu1 %v2947_v63, %s2766_s18  ;;  %580 = vrot.lane.b32.xlu2 %v515_v45, %s2767_s19  ;;  %v214_v45 = vpack.c.bf16 %v182_v39, %v182_v39 }
  0x42   : > { %v278_v48 = vunpack.c.l.b16 %v214_v45 }
  0x47   : > { %534 = vrot.lane.b32.xlu0 %v2957_v16, %s2766_s18 }
  0x48   : > { %582 = vrot.lane.b32.xlu1 %v516_v38, %s2767_s19  ;;  %536 = vrot.lane.b32.xlu2 %v2991_v56, %s2766_s18  ;;  %v392_v38 = vor.u32 %v390_v41, %v389_v36  ;;  %v396_v41 = vrot.slane %v394_v50, 7 }
  0x4a   : > { %v457_v47 = vsel %vm2985_vm6, 0, %v392_v38  ;;  %v399_v62 = vor.u32 %v397_v44, %v396_v41  ;;  %v319_v41 = vrot.slane %v317_v33, 7 }
  0x4c   : > { %v322_v33 = vor.u32 %v320_v27, %v319_v41 }
  0x4f   : > { %584 = vrot.lane.b32.xlu0 %v517_v3, %s2767_s19 }
  0x50   : > { %538 = vrot.lane.b32.xlu1 %v3033_v30, %s2766_s18 }
  0x72   : > { %v551_v34 = vpop.permute.xlu2 %550 }
  0x73   : > { %v643_v49 = vsel %vm610_vm7, %v457_v47, %v551_v34  ;;  %v403_v34 = vrot.slane %v401_v8, 7 }
  0x7a   : > { %v599_v53 = vpop.permute.xlu2 %598 }
  0x7b   : > { %v3052_v54 = vsel %vm659_vm8, %v643_v49, %v599_v53 }
  0x82   : > { %v555_v45 = vpop.permute.xlu2 %554 }
  0x89   : > { %v547_v43 = vpop.permute.xlu0 %546 }
  0x8a   : > { %v637_v32 = vsel %vm610_vm7, %v455_v55, %v547_v43  ;;  %v549_v1 = vpop.permute.xlu1 %548  ;;  %v183_v43 = vld [vmem:[%s2804_s17 + $0x58] sm:$0xff]  ;;  %v605_v49 = vpop.permute.xlu2 %604 }
  0x8b   : > { %v640_v6 = vsel %vm610_vm7, %v456_v5, %v549_v1  ;;  %v215_v46 = vpack.c.bf16 %v183_v43, %v183_v43  ;;  %v184_v5 = vld [vmem:[%s2804_s17 + $0x60] sm:$0xff] }
  0x8c   : > { %v216_v37 = vpack.c.bf16 %v184_v5, %v184_v5 }
  0x8d   : > { %v279_v31 = vunpack.c.l.b16 %v215_v46  ;;  %v406_v46 = vor.u32 %v404_v0, %v403_v34 }
  0x8e   : > { %v280_v35 = vunpack.c.l.b16 %v216_v37 }
  0x8f   : > { %v3043_v40 = vpack.c.b16 %v279_v31, %v278_v48  ;;  %v459_v48 = vsel %vm2985_vm6, 0, %v406_v46 }
  0x90   : > { %v649_v53 = vsel %vm610_vm7, %v459_v48, %v555_v45  ;;  %v333_v48 = vrot.slane %v331_v18, 7  ;;  %v340_v18 = vrot.slane %v338_v59, 7 }
  0x91   : > { %v595_v57 = vpop.permute.xlu0 %594  ;;  %540 = vrot.lane.b32.xlu0 %v3043_v40, %s2766_s18  ;;  %v355_v29 = vshll.u32 %v3043_v40, 16  ;;  %v352_v55 = vshrl.u32 %v3043_v40, 16 }
  0x92   : > { %v2996_v58 = vsel %vm659_vm8, %v637_v32, %v595_v57  ;;  %v597_v9 = vpop.permute.xlu1 %596  ;;  %v345_v57 = vshrl.u32 %v3033_v30, 16  ;;  %v343_v16 = vor.u32 %v341_v24, %v340_v18 }
  0x93   : > { %2585 = vmatmul.msk.bf16.vlgmr.msra.gmra.mxu2 %vm708_vm9, %v2996_v58  ;;  %2606 = vmatmul.msk.bf16.vlgmr.msra.gmra.mxu3 %vm708_vm9, %v2996_v58  ;;  %v3022_v15 = vsel %vm659_vm8, %v640_v6, %v597_v9  ;;  %v473_v32 = vrot.slane %v355_v29, 1  ;;  %v185_v6 = vld [vmem:[%s2804_s17 + $0x68] sm:$0xff]  ;;  %v458_v9 = vsel %vm2985_vm6, 0, %v399_v62  ;;  %v410_v62 = vrot.slane %v408_v14, 7 }
  0x94   : > { %v472_v3 = vor.u32 %v471_v61, %v345_v57  ;;  %v217_v44 = vpack.c.bf16 %v185_v6, %v185_v6  ;;  %v347_v59 = vrot.slane %v345_v57, 7 }
  0x95   : > { %v474_v50 = vor.u32 %v473_v32, %v352_v55  ;;  %v186_v32 = vld [vmem:[%s2804_s17 + $0x70] sm:$0xff]  ;;  %v413_v14 = vor.u32 %v411_v7, %v410_v62 }
  0x96   : > { %v518_v4 = vsel %vm2840_vm2, %v472_v3, 0  ;;  %v281_v11 = vunpack.c.l.b16 %v217_v44  ;;  %v218_v0 = vpack.c.bf16 %v186_v32, %v186_v32  ;;  %v350_v24 = vor.u32 %v348_v60, %v347_v59 }
  0x97   : > { %v519_v1 = vsel %vm2840_vm2, %v474_v50, 0  ;;  %586 = vrot.lane.b32.xlu2 %v518_v4, %s2767_s19  ;;  %v187_v50 = vld [vmem:[%s2804_s17 + $0x78] sm:$0xff]  ;;  %v531_v4 = vpop.permute.xlu2 %530  ;;  %v460_v22 = vsel %vm2985_vm6, 0, %v413_v14  ;;  %v354_v14 = vrot.slane %v352_v55, 7 }
  0x98   : > { %588 = vrot.lane.b32.xlu1 %v519_v1, %s2767_s19  ;;  %v3082_v26 = vpack.c.b16 %v281_v11, %v280_v35  ;;  %v219_v61 = vpack.c.bf16 %v187_v50, %v187_v50  ;;  %v282_v1 = vunpack.c.l.b16 %v218_v0  ;;  %v417_v11 = vrot.slane %v415_v23, 7 }
  0x99   : > { %v553_v10 = vpop.permute.xlu0 %552  ;;  %v450_v0 = vsel %vm2985_vm6, 0, %v343_v16  ;;  %v357_v60 = vor.u32 %v355_v29, %v354_v14 }
  0x9a   : > { %v646_v12 = vsel %vm610_vm7, %v458_v9, %v553_v10  ;;  %v601_v20 = vpop.permute.xlu1 %600  ;;  %v362_v36 = vshll.u32 %v3082_v26, 16  ;;  %v359_v39 = vshrl.u32 %v3082_v26, 16  ;;  %v283_v3 = vunpack.c.l.b16 %v219_v61 }
  0x9b   : > { %v3085_v28 = vsel %vm659_vm8, %v646_v12, %v601_v20  ;;  %v447_v9 = vsel %vm2985_vm6, 0, %v322_v33  ;;  %v329_v12 = vor.u32 %v327_v25, %v326_v2 }
  0x9c   : > { %v475_v43 = vrot.slane %v362_v36, 1  ;;  %v3124_v5 = vpack.c.b16 %v283_v3, %v282_v1  ;;  %v613_v37 = vsel %vm610_vm7, %v447_v9, %v531_v4  ;;  %v451_v4 = vsel %vm2985_vm6, 0, %v350_v24 }
  0x9d   : > { %v448_v21 = vsel %vm2985_vm6, 0, %v329_v12  ;;  %v361_v40 = vrot.slane %v359_v39, 7 }
  0x9e   : > { %v476_v8 = vor.u32 %v475_v43, %v359_v39  ;;  %v366_v20 = vshrl.u32 %v3124_v5, 16  ;;  %v369_v34 = vshll.u32 %v3124_v5, 16  ;;  %v420_v43 = vor.u32 %v418_v19, %v417_v11 }
  0x9f   : > { %542 = vrot.lane.b32.xlu2 %v3082_v26, %s2766_s18  ;;  %v202_v26 = vld [vmem:[%s2804_s17 + $0xf0] sm:$0xff] }
  0xa0   : > { %v520_v47 = vsel %vm2840_vm2, %v476_v8, 0  ;;  %544 = vrot.lane.b32.xlu1 %v3124_v5, %s2766_s18  ;;  %v477_v23 = vrot.slane %v369_v34, 1 }
  0xa1   : > { %v603_v38 = vpop.permute.xlu0 %602  ;;  %590 = vrot.lane.b32.xlu0 %v520_v47, %s2767_s19  ;;  %v461_v47 = vsel %vm2985_vm6, 0, %v420_v43  ;;  %v234_v43 = vpack.c.bf16 %v202_v26, %v202_v26 }
  0xa2   : > { %v3114_v51 = vsel %vm659_vm8, %v649_v53, %v603_v38  ;;  %v557_v10 = vpop.permute.xlu1 %556  ;;  %v581_v38 = vpop.permute.xlu2 %580  ;;  %v478_v63 = vor.u32 %v477_v23, %v366_v20  ;;  %v368_v23 = vrot.slane %v366_v20, 7 }
  0xa3   : > { %2586 = vmatmul.msk.bf16.gmra.mxu2 %vm708_vm9, %v3022_v15  ;;  %2607 = vmatmul.msk.bf16.gmra.mxu3 %vm708_vm9, %v3022_v15  ;;  %v652_v27 = vsel %vm610_vm7, %v460_v22, %v557_v10 }
  0xa4   : > { %v3141_v7 = vsel %vm659_vm8, %v652_v27, %v605_v49  ;;  %v521_v46 = vsel %vm2840_vm2, %v478_v63, 0  ;;  %v336_v49 = vor.u32 %v334_v17, %v333_v48  ;;  %v371_v63 = vor.u32 %v369_v34, %v368_v23 }
  0xa6   : > { %v449_v41 = vsel %vm2985_vm6, 0, %v336_v49 }
  0xa7   : > { %592 = vrot.lane.b32.xlu2 %v521_v46, %s2767_s19 }
  0xa9   : > { %v559_v31 = vpop.permute.xlu0 %558 }
  0xaa   : > { %v607_v35 = vpop.permute.xlu1 %606  ;;  %v655_v13 = vsel %vm610_vm7, %v461_v47, %v559_v31  ;;  %v537_v17 = vpop.permute.xlu2 %536 }
  0xab   : > { %v3172_v19 = vsel %vm659_vm8, %v655_v13, %v607_v35  ;;  %v622_v61 = vsel %vm610_vm7, %v450_v0, %v537_v17  ;;  %v364_v35 = vor.u32 %v362_v36, %v361_v40  ;;  %v203_v36 = vld [vmem:[%s2804_s17 + $0xf8] sm:$0xff]  ;;  %v454_v13 = vsel %vm2985_vm6, 0, %v371_v63 }
  0xad   : > { %v453_v11 = vsel %vm2985_vm6, 0, %v364_v35 }
  0xb1   : > { %v579_v6 = vpop.permute.xlu0 %578 }
  0xb2   : > { %v661_v44 = vsel %vm659_vm8, %v613_v37, %v579_v6  ;;  %v533_v45 = vpop.permute.xlu1 %532  ;;  %v452_v37 = vsel %vm2985_vm6, 0, %v357_v60 }
  0xb3   : > { %2587 = vmatmul.msk.bf16.gmra.mxu2 %vm708_vm9, %v3052_v54  ;;  %2608 = vmatmul.msk.bf16.gmra.mxu3 %vm708_vm9, %v3052_v54  ;;  %v616_v8 = vsel %vm610_vm7, %v448_v21, %v533_v45  ;;  %v235_v45 = vpack.c.bf16 %v203_v36, %v203_v36 }
  0xb4   : > { %2577 = vmatmul.msk.bf16.vlgmr.msra.gmra.mxu0 %vm708_vm9, %v661_v44  ;;  %v663_v25 = vsel %vm659_vm8, %v616_v8, %v581_v38 }
  0xb5   : > { %2599 = vmatmul.msk.bf16.vlgmr.msra.gmra.mxu1 %vm708_vm9, %v663_v25  ;;  %v299_v46 = vunpack.c.l.b16 %v235_v45 }
  0xb9   : > { %v535_v53 = vpop.permute.xlu0 %534 }
  0xba   : > { %v619_v31 = vsel %vm610_vm7, %v449_v41, %v535_v53  ;;  %v583_v32 = vpop.permute.xlu1 %582 }
  0xbb   : > { %v665_v50 = vsel %vm659_vm8, %v619_v31, %v583_v32 }
  0xc1   : > { %v585_v62 = vpop.permute.xlu0 %584 }
  0xc2   : > { %v667_v1 = vsel %vm659_vm8, %v622_v61, %v585_v62  ;;  %v539_v33 = vpop.permute.xlu1 %538 }
  0xc3   : > { %2588 = vmatmul.msk.bf16.gmra.mxu2 %vm708_vm9, %v3085_v28  ;;  %2609 = vmatmul.msk.bf16.gmra.mxu3 %vm708_vm9, %v3085_v28  ;;  %v625_v6 = vsel %vm610_vm7, %v451_v4, %v539_v33 }
  0xc4   : > { %2578 = vmatmul.msk.bf16.gmra.mxu0 %vm708_vm9, %v663_v25 }
  0xc5   : > { %2600 = vmatmul.msk.bf16.gmra.mxu1 %vm708_vm9, %v665_v50 }
  0xd3   : > { %2589 = vmatmul.msk.bf16.gmra.mxu2 %vm708_vm9, %v3114_v51  ;;  %2610 = vmatmul.msk.bf16.gmra.mxu3 %vm708_vm9, %v3114_v51 }
  0xd4   : > { %2579 = vmatmul.msk.bf16.gmra.mxu0 %vm708_vm9, %v665_v50 }
  0xd5   : > { %2601 = vmatmul.msk.bf16.gmra.mxu1 %vm708_vm9, %v667_v1 }
  0xe3   : > { %2590 = vmatmul.msk.bf16.gmra.mxu2 %vm708_vm9, %v3141_v7  ;;  %2611 = vmatmul.msk.bf16.gmra.mxu3 %vm708_vm9, %v3141_v7 }
  0xe4   : > { %2580 = vmatmul.msk.bf16.gmra.mxu0 %vm708_vm9, %v667_v1 }
  0xf1   : > { %v587_v3 = vpop.permute.xlu2 %586 }
  0xf2   : > { %v669_v9 = vsel %vm659_vm8, %v625_v6, %v587_v3 }
  0xf3   : > { %2591 = vmatmul.msk.bf16.gmra.mxu2 %vm708_vm9, %v3172_v19  ;;  %2612 = vmatmul.msk.bf16.gmra.mxu3 %vm708_vm9, %v3172_v19 }
  0xf4   : > { %2581 = vmatmul.msk.bf16.gmra.mxu0 %vm708_vm9, %v669_v9  ;;  %2602 = vmatmul.msk.bf16.gmra.mxu1 %vm708_vm9, %v669_v9 }
  0xf9   : > { %v543_v2 = vpop.permute.xlu2 %542 }
  0xfa   : > { %v631_v12 = vsel %vm610_vm7, %v453_v11, %v543_v2 }
 0x101   : > { %v593_v47 = vpop.permute.xlu2 %592 }
 0x103   : > { %2618 = vmatmul.msk.bf16.vlgmr.msrb.gmra.mxu2 %vm708_vm9, %v661_v44  ;;  %v541_v10 = vpop.permute.xlu0 %540 }
 0x104   : > { %v628_v44 = vsel %vm610_vm7, %v452_v37, %v541_v10 }
 0x10a   : > { %v589_v22 = vpop.permute.xlu1 %588 }
 0x10b   : > { %v671_v27 = vsel %vm659_vm8, %v628_v44, %v589_v22 }
 0x10c   : > { %2582 = vmatmul.msk.bf16.gmra.mxu0 %vm708_vm9, %v671_v27  ;;  %2603 = vmatmul.msk.bf16.gmra.mxu1 %vm708_vm9, %v671_v27 }
 0x112   : > { %v545_v48 = vpop.permute.xlu1 %544 }
 0x113   : > { %2619 = vmatmul.msk.bf16.gmra.mxu2 %vm708_vm9, %v663_v25  ;;  %v591_v21 = vpop.permute.xlu0 %590  ;;  %v298_v25 = vunpack.c.l.b16 %v234_v43  ;;  %v634_v20 = vsel %vm610_vm7, %v454_v13, %v545_v48 }
 0x114   : > { %v673_v38 = vsel %vm659_vm8, %v631_v12, %v591_v21  ;;  %v675_v53 = vsel %vm659_vm8, %v634_v20, %v593_v47 }
 0x115   : > { %v315_v49 = vpack.c.b16 %v299_v46, %v298_v25 }
 0x116   : > { %v3202_v56 = vpop.f32.mrf.mxu2  ;;  %v3325_v63 = vpop.f32.mrf.mxu3 }
 0x117   : > { %560 = vrot.lane.b32.xlu0 %v315_v49, %s2766_s18  ;;  %v425_v41 = vshll.u32 %v315_v49, 16  ;;  %v422_v5 = vshrl.u32 %v315_v49, 16 }
 0x119   : > { %v493_v34 = vrot.slane %v425_v41, 1  ;;  %v424_v11 = vrot.slane %v422_v5, 7 }
 0x11b   : > { %v494_v32 = vor.u32 %v493_v34, %v422_v5  ;;  %v427_v21 = vor.u32 %v425_v41, %v424_v11 }
 0x11c   : > { %2583 = vmatmul.msk.bf16.gmra.mxu0 %vm708_vm9, %v673_v38  ;;  %2604 = vmatmul.msk.bf16.gmra.mxu1 %vm708_vm9, %v673_v38 }
 0x11e   : > { %v3212_v57 = vpop.f32.mrf.mxu2  ;;  %v3333_v46 = vpop.f32.mrf.mxu3 }
 0x123   : > { %2620 = vmatmul.msk.bf16.gmra.mxu2 %vm708_vm9, %v665_v50  ;;  %v529_v50 = vsel %vm2840_vm2, %v494_v32, 0 }
 0x124   : > { %608 = vrot.lane.b32.xlu1 %v529_v50, %s2767_s19 }
 0x126   : > { %v3217_v30 = vpop.f32.mrf.mxu2  ;;  %v3337_v48 = vpop.f32.mrf.mxu3 }
 0x12c   : > { %2584 = vmatmul.msk.bf16.gmra.mxu0 %vm708_vm9, %v675_v53  ;;  %2605 = vmatmul.msk.bf16.gmra.mxu1 %vm708_vm9, %v675_v53 }
 0x12e   : > { %v3227_v55 = vpop.f32.mrf.mxu2 }
 0x131   : > { %v752_v3 = vpop.f32.mrf.mxu0 }
 0x133   : > { %2621 = vmatmul.msk.bf16.gmra.mxu2 %vm708_vm9, %v667_v1  ;;  %v854_v1 = vpop.f32.mrf.mxu1 }
 0x136   : > { %v3232_v29 = vpop.f32.mrf.mxu2 }
 0x139   : > { %v3290_v60 = vpop.f32.mrf.mxu0 }
 0x13b   : > { %v3284_v4 = vpop.f32.mrf.mxu1 }
 0x13e   : > { %v3242_v39 = vpop.f32.mrf.mxu2 }
 0x141   : > { %v757_v37 = vpop.f32.mrf.mxu0 }
 0x143   : > { %2622 = vmatmul.msk.bf16.gmra.mxu2 %vm708_vm9, %v669_v9  ;;  %v859_v9 = vpop.f32.mrf.mxu1 }
 0x146   : > { %v3249_v8 = vpop.f32.mrf.mxu2 }
 0x147   : > { %4722 = vst [vmem:[#allocation4_spill] sm:$0xff] %v3249_v8 }
 0x14b   : > { %v861_v47 = vpop.f32.mrf.mxu1 }
 0x14e   : > { %v3260_v31 = vpop.f32.mrf.mxu2 }
 0x14f   : > { %4723 = vst [vmem:[#allocation5_spill] sm:$0xff] %v3260_v31 }
 0x153   : > { %2623 = vmatmul.msk.bf16.gmra.mxu2 %vm708_vm9, %v671_v27  ;;  %v3300_v27 = vpop.f32.mrf.mxu0  ;;  %v864_v20 = vpop.f32.mrf.mxu1 }
 0x156   : > { %v3266_v18 = vpop.f32.mrf.mxu2 }
 0x157   : > { %4724 = vst [vmem:[#allocation6_spill] sm:$0xff] %v3266_v18 }
 0x15e   : > { %v3268_v16 = vpop.f32.mrf.mxu2 }
 0x15f   : > { %4725 = vst [vmem:[#allocation7_spill] sm:$0xff] %v3268_v16 }
 0x163   : > { %2624 = vmatmul.msk.bf16.gmra.mxu2 %vm708_vm9, %v673_v38 }
 0x166   : > { %v3271_v17 = vpop.f32.mrf.mxu2 }
 0x167   : > { %4726 = vst [vmem:[#allocation8_spill] sm:$0xff] %v3271_v17 }
 0x16e   : > { %v3273_v0 = vpop.f32.mrf.mxu2 }
 0x16f   : > { %4727 = vst [vmem:[#allocation9_spill] sm:$0xff] %v3273_v0 }
 0x173   : > { %2625 = vmatmul.msk.bf16.gmra.mxu2 %vm708_vm9, %v675_v53  ;;  %v3342_v53 = vpop.f32.mrf.mxu3 }
 0x176   : > { %v3276_v61 = vpop.f32.mrf.mxu2 }
 0x177   : > { %4728 = vst [vmem:[#allocation10_spill] sm:$0xff] %v3276_v61 }
 0x17b   : > { %v899_v34 = vpop.f32.mrf.mxu3 }
 0x17e   : > { %v3278_v62 = vpop.f32.mrf.mxu2 }
 0x17f   : > { %4729 = vst [vmem:[#allocation11_spill] sm:$0xff] %v3278_v62 }
 0x183   : > { %2626 = vmatmul.msk.bf16.gmra.mxu2 %vm708_vm9, %v2996_v58 }
 0x186   : > { %v950_v59 = vpop.f32.mrf.mxu2 }
 0x187   : > { %v3282_v24 = vadd.f32 %v950_v59, %v854_v1 }
 0x189   : > { %4730 = vst [vmem:[#allocation12_spill] sm:$0xff] %v3282_v24  ;;  %v561_v38 = vpop.permute.xlu0 %560 }
 0x18e   : > { %v3286_v33 = vpop.f32.mrf.mxu2 }
 0x18f   : > { %v3381_v62 = vadd.f32 %v3286_v33, %v3284_v4  ;;  %v1132_v4 = vmul.f32 %v3282_v24, %v3282_v24 }
 0x191   : > { %4735 = vst [vmem:[#allocation17_spill] sm:$0xff] %v3381_v62  ;;  %v1133_v16 = vmul.f32 %v3381_v62, %v3381_v62 }
 0x193   : > { %2627 = vmatmul.msk.bf16.gmra.mxu2 %vm708_vm9, %v3022_v15  ;;  %v762_v15 = vpop.f32.mrf.mxu0 }
 0x196   : > { %v955_v6 = vpop.f32.mrf.mxu2  ;;  %v609_v26 = vpop.permute.xlu1 %608 }
 0x197   : > { %v956_v14 = vadd.f32 %v955_v6, %v752_v3  ;;  %v3350_v3 = vpop.f32.mrf.mxu3 }
 0x199   : > { %v3292_v10 = vadd.f32 %v956_v14, %v859_v9 }
 0x19b   : > { %4731 = vst [vmem:[#allocation13_spill] sm:$0xff] %v3292_v10  ;;  %v1134_v33 = vmul.f32 %v3292_v10, %v3292_v10 }
 0x19e   : > { %v3294_v58 = vpop.f32.mrf.mxu2 }
 0x19f   : > { %v958_v61 = vadd.f32 %v3294_v58, %v3290_v60  ;;  %v1063_v60 = vsel %vm610_vm7, %v3381_v62, 0.0  ;;  %v1164_v62 = vsel %vm610_vm7, %v1132_v4, 0.0 }
 0x1a1   : > { %v3389_v18 = vadd.f32 %v958_v61, %v861_v47  ;;  %v1062_v61 = vsel %vm610_vm7, %v3282_v24, 0.0 }
 0x1a3   : > { %2628 = vmatmul.msk.bf16.gmra.mxu2 %vm708_vm9, %v3052_v54  ;;  %v462_v54 = vsel %vm2985_vm6, 0, %v427_v21  ;;  %4736 = vst [vmem:[#allocation18_spill] sm:$0xff] %v3389_v18  ;;  %v1135_v8 = vmul.f32 %v3389_v18, %v3389_v18 }
 0x1a4   : > { %v658_v23 = vsel %vm610_vm7, %v462_v54, %v561_v38 }
 0x1a6   : > { %v960_v44 = vpop.f32.mrf.mxu2 }
 0x1a7   : > { %v3298_v22 = vadd.f32 %v960_v44, %v757_v37 }
 0x1a9   : > { %v3402_v58 = vadd.f32 %v3298_v22, %v864_v20  ;;  %v1064_v22 = vadd.f32 %v1063_v60, %v1062_v61  ;;  %v1167_v20 = vsel %vm610_vm7, %v1134_v33, 0.0  ;;  %v1169_v33 = vsel %vm610_vm7, %v1135_v8, 0.0 }
 0x1ab   : > { %v1069_v60 = vsel %vm610_vm7, %v3402_v58, 0.0 }
 0x1ae   : > { %v3302_v40 = vpop.f32.mrf.mxu2 }
 0x1af   : > { %v963_v31 = vadd.f32 %v3302_v40, %v3300_v27  ;;  %v1165_v40 = vsel %vm610_vm7, %v1133_v16, 0.0  ;;  %v1136_v16 = vmul.f32 %v3402_v58, %v3402_v58 }
 0x1b3   : > { %2629 = vmatmul.msk.bf16.gmra.mxu2 %vm708_vm9, %v3085_v28  ;;  %v691_v28 = vsel %vm659_vm8, %v658_v23, %v609_v26 }
 0x1b4   : > { %2613 = vmatmul.msk.bf16.gmra.mxu3 %vm708_vm9, %v691_v28 }
 0x1b6   : > { %v965_v35 = vpop.f32.mrf.mxu2 }
 0x1b7   : > { %v3306_v2 = vadd.f32 %v965_v35, %v762_v15  ;;  %v3355_v15 = vpop.f32.mrf.mxu3 }
 0x1be   : > { %v3308_v12 = vpop.f32.mrf.mxu2 }
 0x1bf   : > { %v3361_v54 = vpop.f32.mrf.mxu3 }
 0x1c0   : > { %4732 = vst [vmem:[#allocation14_spill] sm:$0xff] %v3361_v54 }
 0x1c3   : > { %2630 = vmatmul.msk.bf16.gmra.mxu2 %vm708_vm9, %v3114_v51 }
 0x1c6   : > { %v3317_v36 = vpop.f32.mrf.mxu2 }
 0x1ce   : > { %v3319_v43 = vpop.f32.mrf.mxu2 }
 0x1d3   : > { %2631 = vmatmul.msk.bf16.gmra.mxu2 %vm708_vm9, %v3141_v7  ;;  %v764_v7 = vpop.f32.mrf.mxu0 }
 0x1d4   : > { %v968_v47 = vadd.f32 %v3308_v12, %v764_v7  ;;  %v1067_v12 = vsel %vm610_vm7, %v3389_v18, 0.0 }
 0x1d6   : > { %v3323_v45 = vpop.f32.mrf.mxu2 }
 0x1db   : > { %v767_v41 = vpop.f32.mrf.mxu0 }
 0x1dc   : > { %v971_v24 = vadd.f32 %v3317_v36, %v767_v41 }
 0x1de   : > { %v3327_v25 = vpop.f32.mrf.mxu2 }
 0x1e3   : > { %2632 = vmatmul.msk.bf16.gmra.mxu2 %vm708_vm9, %v3172_v19  ;;  %v866_v19 = vpop.f32.mrf.mxu1  ;;  %v769_v50 = vpop.f32.mrf.mxu0 }
 0x1e4   : > { %v973_v18 = vadd.f32 %v3319_v43, %v769_v50 }
 0x1e6   : > { %v3331_v51 = vpop.f32.mrf.mxu2 }
 0x1eb   : > { %v869_v1 = vpop.f32.mrf.mxu1  ;;  %v772_v6 = vpop.f32.mrf.mxu0 }
 0x1ec   : > { %v3423_v7 = vadd.f32 %v3306_v2, %v869_v1  ;;  %v976_v1 = vadd.f32 %v3323_v45, %v772_v6 }
 0x1ee   : > { %v3335_v13 = vpop.f32.mrf.mxu2  ;;  %v1138_v8 = vmul.f32 %v3423_v7, %v3423_v7  ;;  %v1073_v45 = vsel %vm610_vm7, %v3423_v7, 0.0 }
 0x1f3   : > { %2633 = vmatmul.msk.bf16.gmra.mxu2 %vm708_vm9, %v691_v28  ;;  %v871_v9 = vpop.f32.mrf.mxu1  ;;  %v3357_v35 = vpop.f32.mrf.mxu0 }
 0x1f4   : > { %v3367_v28 = vpop.f32.mrf.mxu3 }
 0x1f5   : > { %4733 = vst [vmem:[#allocation15_spill] sm:$0xff] %v3367_v28  ;;  %v3412_v28 = vadd.f32 %v963_v31, %v866_v19  ;;  %v1166_v31 = vadd.f32 %v1165_v40, %v1164_v62  ;;  %v1171_v62 = vsel %vm610_vm7, %v1136_v16, 0.0  ;;  %v978_v40 = vadd.f32 %v3327_v25, %v3357_v35 }
 0x1f6   : > { %v3340_v49 = vpop.f32.mrf.mxu2 }
 0x1f7   : > { %v1137_v61 = vmul.f32 %v3412_v28, %v3412_v28  ;;  %v1071_v36 = vsel %vm610_vm7, %v3412_v28, 0.0 }
 0x1f9   : > { %v1173_v50 = vsel %vm610_vm7, %v1137_v61, 0.0 }
 0x1fb   : > { %v874_v21 = vpop.f32.mrf.mxu1  ;;  %v3363_v38 = vpop.f32.mrf.mxu0 }
 0x1fc   : > { %v3440_v41 = vadd.f32 %v971_v24, %v874_v21 }
 0x1fe   : > { %v3344_v5 = vpop.f32.mrf.mxu2 }
 0x203   : > { %v876_v26 = vpop.f32.mrf.mxu1 }
 0x204   : > { %v3449_v6 = vadd.f32 %v973_v18, %v876_v26  ;;  %v981_v18 = vadd.f32 %v3331_v51, %v3363_v38 }
 0x206   : > { %v3346_v32 = vpop.f32.mrf.mxu2 }
 0x20e   : > { %v3348_v59 = vpop.f32.mrf.mxu2 }
 0x216   : > { %v995_v14 = vpop.f32.mrf.mxu2 }
 0x217   : > { %v996_v37 = vadd.f32 %v995_v14, %v3202_v56  ;;  %v3371_v56 = vpop.f32.mrf.mxu0 }
 0x219   : > { %v3353_v44 = vadd.f32 %v996_v37, %v899_v34  ;;  %v879_v34 = vpop.f32.mrf.mxu1  ;;  %v3375_v37 = vpop.f32.mrf.mxu3 }
 0x21a   : > { %4734 = vst [vmem:[#allocation16_spill] sm:$0xff] %v3375_v37  ;;  %v3453_v21 = vadd.f32 %v976_v1, %v879_v34  ;;  %v1077_v34 = vsel %vm610_vm7, %v3440_v41, 0.0 }
 0x21c   : > { %v1142_v51 = vmul.f32 %v3453_v21, %v3453_v21 }
 0x21e   : > { %v3359_v11 = vpop.f32.mrf.mxu2 }
 0x21f   : > { %v3377_v42 = vpop.f32.mrf.mxu0 }
 0x221   : > { %v881_v0 = vpop.f32.mrf.mxu1  ;;  %v3393_v37 = vpop.f32.mrf.mxu3 }
 0x222   : > { %4737 = vst [vmem:[#allocation19_spill] sm:$0xff] %v3393_v37  ;;  %v1065_v37 = vsel %vm610_vm7, %v3292_v10, 0.0  ;;  %v3426_v10 = vadd.f32 %v968_v47, %v871_v9 }
 0x223   : > { %v1066_v19 = vadd.f32 %v1065_v37, %v1064_v22 }
 0x224   : > { %v1139_v43 = vmul.f32 %v3426_v10, %v3426_v10  ;;  %v1075_v16 = vsel %vm610_vm7, %v3426_v10, 0.0 }
 0x225   : > { %v1068_v2 = vadd.f32 %v1067_v12, %v1066_v19  ;;  %v1175_v12 = vsel %vm610_vm7, %v1138_v8, 0.0  ;;  %v1141_v19 = vmul.f32 %v3449_v6, %v3449_v6 }
 0x226   : > { %v3365_v23 = vpop.f32.mrf.mxu2  ;;  %v1177_v35 = vsel %vm610_vm7, %v1139_v43, 0.0 }
 0x227   : > { %v784_v27 = vpop.f32.mrf.mxu0  ;;  %v1070_v47 = vadd.f32 %v1069_v60, %v1068_v2  ;;  %v983_v60 = vadd.f32 %v3335_v13, %v3371_v56  ;;  %v1181_v56 = vsel %vm610_vm7, %v1141_v19, 0.0 }
 0x228   : > { %v988_v13 = vadd.f32 %v3344_v5, %v784_v27 }
 0x229   : > { %v884_v4 = vpop.f32.mrf.mxu1  ;;  %v3442_v9 = vpop.f32.mrf.mxu3  ;;  %v1072_v24 = vadd.f32 %v1071_v36, %v1070_v47  ;;  %v1081_v47 = vsel %vm610_vm7, %v3453_v21, 0.0 }
 0x22a   : > { %v3478_v36 = vadd.f32 %v981_v18, %v884_v4  ;;  %v3504_v18 = vadd.f32 %v988_v13, %v3333_v46 }
 0x22b   : > { %v1074_v25 = vadd.f32 %v1073_v45, %v1072_v24 }
 0x22c   : > { %v1144_v27 = vmul.f32 %v3478_v36, %v3478_v36  ;;  %v1091_v13 = vsel %vm610_vm7, %v3504_v18, 0.0 }
 0x22d   : > { %v1076_v2 = vadd.f32 %v1075_v16, %v1074_v25  ;;  %v1085_v25 = vsel %vm610_vm7, %v3478_v36, 0.0 }
 0x22e   : > { %v3369_v52 = vpop.f32.mrf.mxu2 }
 0x231   : > { %v886_v38 = vpop.f32.mrf.mxu1  ;;  %v3490_v45 = vpop.f32.mrf.mxu3 }
 0x236   : > { %v3373_v14 = vpop.f32.mrf.mxu2 }
 0x23e   : > { %v3385_v17 = vpop.f32.mrf.mxu2 }
 0x246   : > { %v3416_v54 = vpop.f32.mrf.mxu2 }
 0x247   : > { %4738 = vst [vmem:[#allocation20_spill] sm:$0xff] %v3416_v54  ;;  %v1168_v54 = vadd.f32 %v1167_v20, %v1166_v31  ;;  %v787_v20 = vpop.f32.mrf.mxu0  ;;  %v1140_v31 = vmul.f32 %v3440_v41, %v3440_v41 }
 0x248   : > { %v991_v24 = vadd.f32 %v3346_v32, %v787_v20  ;;  %v1187_v32 = vsel %vm610_vm7, %v1144_v27, 0.0 }
 0x249   : > { %v1170_v37 = vadd.f32 %v1169_v33, %v1168_v54  ;;  %v3469_v33 = vadd.f32 %v978_v40, %v881_v0  ;;  %v1179_v1 = vsel %vm610_vm7, %v1140_v31, 0.0  ;;  %v986_v0 = vadd.f32 %v3340_v49, %v3377_v42 }
 0x24a   : > { %v1183_v42 = vsel %vm610_vm7, %v1142_v51, 0.0  ;;  %v1147_v51 = vmul.f32 %v3504_v18, %v3504_v18 }
 0x24b   : > { %v1172_v22 = vadd.f32 %v1171_v62, %v1170_v37  ;;  %v1079_v62 = vsel %vm610_vm7, %v3449_v6, 0.0  ;;  %v1078_v37 = vadd.f32 %v1077_v34, %v1076_v2  ;;  %v1143_v43 = vmul.f32 %v3469_v33, %v3469_v33 }
 0x24c   : > { %v1083_v5 = vsel %vm610_vm7, %v3469_v33, 0.0 }
 0x24d   : > { %v1174_v26 = vadd.f32 %v1173_v50, %v1172_v22  ;;  %v3488_v50 = vadd.f32 %v983_v60, %v886_v38  ;;  %v1080_v40 = vadd.f32 %v1079_v62, %v1078_v37  ;;  %v3500_v22 = vadd.f32 %v986_v0, %v3325_v63 }
 0x24e   : > { %v3455_v54 = vpop.f32.mrf.mxu2  ;;  %v3518_v60 = vadd.f32 %v991_v24, %v3337_v48  ;;  %v998_v62 = vadd.f32 %v3359_v11, %v3212_v57  ;;  %v1193_v57 = vsel %vm610_vm7, %v1147_v51, 0.0 }
 0x24f   : > { %v1176_v61 = vadd.f32 %v1175_v12, %v1174_v26  ;;  %v1082_v16 = vadd.f32 %v1081_v47, %v1080_v40  ;;  %v789_v31 = vpop.f32.mrf.mxu0  ;;  %v1185_v26 = vsel %vm610_vm7, %v1143_v43, 0.0  ;;  %v1087_v20 = vsel %vm610_vm7, %v3488_v50, 0.0  ;;  %v3537_v43 = vpop.f32.mrf.mxu3 }
 0x250   : > { %v993_v34 = vadd.f32 %v3348_v59, %v789_v31  ;;  %v1146_v46 = vmul.f32 %v3500_v22, %v3500_v22  ;;  %v1089_v38 = vsel %vm610_vm7, %v3500_v22, 0.0  ;;  %v1001_v47 = vadd.f32 %v3365_v23, %v3217_v30 }
 0x251   : > { %v1178_v8 = vadd.f32 %v1177_v35, %v1176_v61  ;;  %v1145_v35 = vmul.f32 %v3488_v50, %v3488_v50  ;;  %v1084_v19 = vadd.f32 %v1083_v5, %v1082_v16  ;;  %v1093_v11 = vsel %vm610_vm7, %v3518_v60, 0.0 }
 0x252   : > { %v1191_v37 = vsel %vm610_vm7, %v1146_v46, 0.0  ;;  %v1003_v5 = vadd.f32 %v3369_v52, %v3227_v55  ;;  %v1006_v23 = vadd.f32 %v3373_v14, %v3232_v29  ;;  %v1150_v16 = vmul.f32 %v3353_v44, %v3353_v44  ;;  %v4741_v46 = vld [vmem:[#allocation4_spill] sm:$0xff] }
 0x253   : > { %v1180_v4 = vadd.f32 %v1179_v1, %v1178_v8  ;;  %v1086_v2 = vadd.f32 %v1085_v25, %v1084_v19  ;;  %v1189_v59 = vsel %vm610_vm7, %v1145_v35, 0.0  ;;  %v3526_v1 = vadd.f32 %v993_v34, %v3342_v53  ;;  %v4739_v25 = vld [vmem:[#allocation14_spill] sm:$0xff] }
 0x254   : > { %v3557_v31 = vadd.f32 %v1001_v47, %v3355_v15  ;;  %v1008_v52 = vadd.f32 %v3385_v17, %v3242_v39  ;;  %v1097_v29 = vsel %vm610_vm7, %v3353_v44, 0.0  ;;  %v3567_v35 = vadd.f32 %v1003_v5, %v4739_v25  ;;  %v4740_v15 = vld [vmem:[#allocation15_spill] sm:$0xff] }
 0x255   : > { %v1182_v12 = vadd.f32 %v1181_v56, %v1180_v4  ;;  %v1088_v8 = vadd.f32 %v1087_v20, %v1086_v2  ;;  %v1148_v56 = vmul.f32 %v3518_v60, %v3518_v60  ;;  %v1149_v40 = vmul.f32 %v3526_v1, %v3526_v1  ;;  %v4745_v5 = vld [vmem:[#allocation19_spill] sm:$0xff] }
 0x256   : > { %v3493_v49 = vpop.f32.mrf.mxu2  ;;  %v3570_v19 = vadd.f32 %v1006_v23, %v4740_v15  ;;  %v1199_v20 = vsel %vm610_vm7, %v1150_v16, 0.0  ;;  %v1152_v17 = vmul.f32 %v3557_v31, %v3557_v31 }
 0x257   : > { %v1184_v63 = vadd.f32 %v1183_v42, %v1182_v12  ;;  %v1090_v4 = vadd.f32 %v1089_v38, %v1088_v8  ;;  %v3545_v42 = vadd.f32 %v998_v62, %v3350_v3  ;;  %v1195_v24 = vsel %vm610_vm7, %v1148_v56, 0.0  ;;  %v4743_v38 = vld [vmem:[#allocation16_spill] sm:$0xff]  ;;  %v4744_v56 = vld [vmem:[#allocation5_spill] sm:$0xff] }
 0x258   : > { %v1095_v12 = vsel %vm610_vm7, %v3526_v1, 0.0  ;;  %v1197_v55 = vsel %vm610_vm7, %v1149_v40, 0.0  ;;  %v3580_v62 = vadd.f32 %v1008_v52, %v4743_v38  ;;  %v1013_v47 = vadd.f32 %v3455_v54, %v4744_v56  ;;  %v4747_v52 = vld [vmem:[#allocation7_spill] sm:$0xff] }
 0x259   : > { %v1186_v61 = vadd.f32 %v1185_v26, %v1184_v63  ;;  %v1092_v30 = vadd.f32 %v1091_v13, %v1090_v4  ;;  %v1151_v14 = vmul.f32 %v3545_v42, %v3545_v42  ;;  %v1099_v39 = vsel %vm610_vm7, %v3545_v42, 0.0 }
 0x25a   : > { %v1153_v13 = vmul.f32 %v3567_v35, %v3567_v35  ;;  %v1103_v40 = vsel %vm610_vm7, %v3567_v35, 0.0  ;;  %v1155_v54 = vmul.f32 %v3580_v62, %v3580_v62 }
 0x25b   : > { %v1188_v0 = vadd.f32 %v1187_v32, %v1186_v61  ;;  %v1094_v26 = vadd.f32 %v1093_v11, %v1092_v30  ;;  %v4742_v61 = vld [vmem:[#allocation20_spill] sm:$0xff]  ;;  %v1201_v8 = vsel %vm610_vm7, %v1151_v14, 0.0  ;;  %v1203_v11 = vsel %vm610_vm7, %v1152_v17, 0.0  ;;  %v4746_v30 = vld [vmem:[#allocation6_spill] sm:$0xff] }
 0x25c   : > { %v1011_v2 = vadd.f32 %v4742_v61, %v4741_v46  ;;  %v1016_v23 = vadd.f32 %v3493_v49, %v4746_v30  ;;  %v1205_v16 = vsel %vm610_vm7, %v1153_v13, 0.0 }
 0x25d   : > { %v1190_v53 = vadd.f32 %v1189_v59, %v1188_v0  ;;  %v1096_v63 = vadd.f32 %v1095_v12, %v1094_v26  ;;  %v924_v0 = vpop.f32.mrf.mxu3  ;;  %v3605_v26 = vadd.f32 %v1013_v47, %v3442_v9 }
 0x25e   : > { %v1017_v48 = vpop.f32.mrf.mxu2  ;;  %v3614_v15 = vadd.f32 %v1016_v23, %v3490_v45 }
 0x25f   : > { %v1192_v27 = vadd.f32 %v1191_v37, %v1190_v53  ;;  %v1098_v59 = vadd.f32 %v1097_v29, %v1096_v63  ;;  %v1101_v37 = vsel %vm610_vm7, %v3557_v31, 0.0  ;;  %v1157_v61 = vmul.f32 %v3605_v26, %v3605_v26 }
 0x260   : > { %v1158_v13 = vmul.f32 %v3614_v15, %v3614_v15 }
 0x261   : > { %v1194_v3 = vadd.f32 %v1193_v57, %v1192_v27  ;;  %v1100_v4 = vadd.f32 %v1099_v39, %v1098_v59  ;;  %v1154_v57 = vmul.f32 %v3570_v19, %v3570_v19  ;;  %v3595_v27 = vadd.f32 %v1011_v2, %v4745_v5 }
 0x262   : > { %v1215_v23 = vsel %vm610_vm7, %v1158_v13, 0.0 }
 0x263   : > { %v1196_v34 = vadd.f32 %v1195_v24, %v1194_v3  ;;  %v1102_v12 = vadd.f32 %v1101_v37, %v1100_v4  ;;  %v1105_v3 = vsel %vm610_vm7, %v3570_v19, 0.0  ;;  %v1207_v25 = vsel %vm610_vm7, %v1154_v57, 0.0 }
 0x264   : > { %v1156_v63 = vmul.f32 %v3595_v27, %v3595_v27  ;;  %v1109_v46 = vsel %vm610_vm7, %v3595_v27, 0.0  ;;  %v1111_v37 = vsel %vm610_vm7, %v3605_v26, 0.0  ;;  %v1113_v4 = vsel %vm610_vm7, %v3614_v15, 0.0 }
 0x265   : > { %v1198_v51 = vadd.f32 %v1197_v55, %v1196_v34  ;;  %v1018_v55 = vadd.f32 %v1017_v48, %v4747_v52  ;;  %v1104_v14 = vadd.f32 %v1103_v40, %v1102_v12  ;;  %v1107_v34 = vsel %vm610_vm7, %v3580_v62, 0.0  ;;  %v4750_v12 = vld [vmem:[#allocation10_spill] sm:$0xff] }
 0x266   : > { %v1020_v32 = vpop.f32.mrf.mxu2  ;;  %v1209_v48 = vsel %vm610_vm7, %v1155_v54, 0.0 }
 0x267   : > { %v1200_v53 = vadd.f32 %v1199_v20, %v1198_v51  ;;  %v4748_v20 = vld [vmem:[#allocation8_spill] sm:$0xff]  ;;  %v1106_v17 = vadd.f32 %v1105_v3, %v1104_v14  ;;  %v3623_v2 = vadd.f32 %v1018_v55, %v3537_v43  ;;  %v4749_v51 = vld [vmem:[#allocation9_spill] sm:$0xff]  ;;  %v1213_v43 = vsel %vm610_vm7, %v1157_v61, 0.0 }
 0x268   : > { %v1021_v39 = vadd.f32 %v1020_v32, %v4748_v20  ;;  %v1211_v32 = vsel %vm610_vm7, %v1156_v63, 0.0 }
 0x269   : > { %v1202_v24 = vadd.f32 %v1201_v8, %v1200_v53  ;;  %v1108_v45 = vadd.f32 %v1107_v34, %v1106_v17  ;;  %v926_v8 = vpop.f32.mrf.mxu3  ;;  %v1159_v57 = vmul.f32 %v3623_v2, %v3623_v2 }
 0x26a   : > { %v3631_v56 = vadd.f32 %v1021_v39, %v924_v0  ;;  %v1115_v0 = vsel %vm610_vm7, %v3623_v2, 0.0 }
 0x26b   : > { %v1204_v29 = vadd.f32 %v1203_v11, %v1202_v24  ;;  %v1110_v53 = vadd.f32 %v1109_v46, %v1108_v45  ;;  %v1217_v52 = vsel %vm610_vm7, %v1159_v57, 0.0 }
 0x26c   : > { %v1160_v24 = vmul.f32 %v3631_v56, %v3631_v56  ;;  %v1117_v55 = vsel %vm610_vm7, %v3631_v56, 0.0 }
 0x26d   : > { %v1206_v9 = vadd.f32 %v1205_v16, %v1204_v29  ;;  %v1112_v5 = vadd.f32 %v1111_v37, %v1110_v53 }
 0x26e   : > { %v1022_v49 = vpop.f32.mrf.mxu2 }
 0x26f   : > { %v1023_v59 = vadd.f32 %v1022_v49, %v4749_v51  ;;  %v1208_v38 = vadd.f32 %v1207_v25, %v1206_v9  ;;  %v1114_v3 = vadd.f32 %v1113_v4, %v1112_v5  ;;  %v1219_v49 = vsel %vm610_vm7, %v1160_v24, 0.0 }
 0x271   : > { %v1210_v47 = vadd.f32 %v1209_v48, %v1208_v38  ;;  %v3638_v11 = vadd.f32 %v1023_v59, %v926_v8  ;;  %v1116_v25 = vadd.f32 %v1115_v0, %v1114_v3  ;;  %v4751_v59 = vld [vmem:[#allocation11_spill] sm:$0xff] }
 0x273   : > { %v1212_v40 = vadd.f32 %v1211_v32, %v1210_v47  ;;  %v1161_v29 = vmul.f32 %v3638_v11, %v3638_v11  ;;  %v1119_v34 = vsel %vm610_vm7, %v3638_v11, 0.0  ;;  %v1118_v20 = vadd.f32 %v1117_v55, %v1116_v25 }
 0x275   : > { %v1214_v16 = vadd.f32 %v1213_v43, %v1212_v40  ;;  %v1221_v9 = vsel %vm610_vm7, %v1161_v29, 0.0  ;;  %v1120_v46 = vadd.f32 %v1119_v34, %v1118_v20 }
 0x276   : > { %v1025_v30 = vpop.f32.mrf.mxu2 }
 0x277   : > { %v3646_v54 = vadd.f32 %v1025_v30, %v4750_v12  ;;  %v1216_v14 = vadd.f32 %v1215_v23, %v1214_v16 }
 0x279   : > { %v1162_v63 = vmul.f32 %v3646_v54, %v3646_v54  ;;  %v1218_v39 = vadd.f32 %v1217_v52, %v1216_v14  ;;  %v1121_v17 = vsel %vm610_vm7, %v3646_v54, 0.0 }
 0x27a   : > { %v1122_v8 = vadd.f32 %v1121_v17, %v1120_v46  ;;  %v1830_v46 = vld [vmem:[%s4706_s2 + $0x8] sm:$0xf] }
 0x27b   : > { %v1220_v48 = vadd.f32 %v1219_v49, %v1218_v39  ;;  %v1223_v51 = vsel %vm610_vm7, %v1162_v63, 0.0 }
 0x27d   : > { %v1222_v45 = vadd.f32 %v1221_v9, %v1220_v48 }
 0x27e   : > { %v1027_v61 = vpop.f32.mrf.mxu2 }
 0x27f   : > { %v3663_v38 = vadd.f32 %v1027_v61, %v4751_v59  ;;  %v1224_v13 = vadd.f32 %v1223_v51, %v1222_v45  ;;  %v2658_v61 = vld [vmem:[%s4706_s2 + $0x20] sm:$0xf]  ;;  %v1836_v51 = vunpack.c.l.b16 %v1830_v46 }
 0x280   : > { %v1966_v59 = vunpack.c.l.b16 %v2658_v61 }
 0x281   : > { %v1123_v32 = vsel %vm610_vm7, %v3663_v38, 0.0  ;;  %v1163_v37 = vmul.f32 %v3663_v38, %v3663_v38 }
 0x282   : > { %v1124_v47 = vadd.f32 %v1123_v32, %v1122_v8  ;;  %v1968_v45 = vpack.c.b16 %v1966_v59, %v1966_v59 }
 0x283   : > { %v1225_v53 = vsel %vm610_vm7, %v1163_v37, 0.0 }
 0x284   : > { %v1125_v43 = vrot.slane %v1124_v47, 4  ;;  %v1226_v4 = vadd.f32 %v1225_v53, %v1224_v13  ;;  %v2636_v13 = vld [vmem:[%s4706_s2 + $0x14] sm:$0xf] }
 0x286   : > { %v1126_v57 = vadd.f32 %v1125_v43, %v1124_v47  ;;  %v1227_v40 = vrot.slane %v1226_v4, 4  ;;  %v2064_v47 = vunpack.c.l.b16 %v2636_v13 }
 0x288   : > { %v1127_v5 = vrot.slane %v1126_v57, 2  ;;  %v1228_v30 = vadd.f32 %v1227_v40, %v1226_v4  ;;  %v2066_v43 = vpack.c.b16 %v2064_v47, %v2064_v47 }
 0x28a   : > { %v1128_v23 = vadd.f32 %v1127_v5, %v1126_v57  ;;  %v1229_v0 = vrot.slane %v1228_v30, 2  ;;  %v4752_v57 = vld [vmem:[#allocation13_spill] sm:$0xff]  ;;  %v4753_v5 = vld [vmem:[#allocation18_spill] sm:$0xff] }
 0x28c   : > { %v1129_v24 = vrot.slane %v1128_v23, 1  ;;  %v1230_v12 = vadd.f32 %v1229_v0, %v1228_v30 }
 0x28e   : > { %v1130_v16 = vadd.f32 %v1129_v24, %v1128_v23  ;;  %v1231_v3 = vrot.slane %v1230_v12, 1  ;;  %v2069_v23 = vsel %vm739_vm3, %v2066_v43, 0  ;;  %v4754_v24 = vld [vmem:[#allocation12_spill] sm:$0xff] }
 0x28f   : > { %2077 = vmatpush.bf16.msrb.mxu1 %v2069_v23 }
 0x290   : > { %v3670_v52 = vmul.f32 0.00390625, %v1130_v16  ;;  %v1232_v55 = vadd.f32 %v1231_v3, %v1230_v12 }
 0x292   : > { %v1233_v29 = vmul.f32 0.00390625, %v1232_v55  ;;  %v1234_v14 = vmul.f32 %v3670_v52, %v3670_v52  ;;  %v1268_v25 = vsub.f32 %v3663_v38, %v3670_v52  ;;  %v1263_v20 = vsub.f32 %v3614_v15, %v3670_v52 }
 0x293   : > { %v1264_v39 = vsub.f32 %v3623_v2, %v3670_v52  ;;  %v1265_v9 = vsub.f32 %v3631_v56, %v3670_v52  ;;  %v1266_v17 = vsub.f32 %v3638_v11, %v3670_v52  ;;  %v1267_v48 = vsub.f32 %v3646_v54, %v3670_v52 }
 0x294   : > { %v1235_v49 = vsub.f32 %v1233_v29, %v1234_v14  ;;  %v1838_v38 = vpack.c.b16 %v1836_v51, %v1836_v51  ;;  %v1973_v11 = vsel %vm739_vm3, %v1968_v45, 0  ;;  %v1239_v40 = vsub.f32 %v4752_v57, %v3670_v52 }
 0x295   : > { %1981 = vmatpush.bf16.msrb.mxu0 %v1973_v11  ;;  %v1240_v30 = vsub.f32 %v4753_v5, %v3670_v52  ;;  %v1237_v12 = vsub.f32 %v4754_v24, %v3670_v52  ;;  %v1241_v16 = vsub.f32 %v3402_v58, %v3670_v52  ;;  %v1242_v55 = vsub.f32 %v3412_v28, %v3670_v52  ;;  %v4755_v28 = vld [vmem:[#allocation17_spill] sm:$0xff] }
 0x296   : > { %v1236_v34 = vmax.f32 %v1235_v49, 0.0  ;;  %v1871_v56 = vsel %vm739_vm3, %v1838_v38, 0  ;;  %v1247_v49 = vsub.f32 %v3453_v21, %v3670_v52  ;;  %v1238_v51 = vsub.f32 %v4755_v28, %v3670_v52 }
 0x297   : > { %1879 = vmatpush.bf16.msrb.mxu3 %v1871_v56  ;;  %v1250_v24 = vsub.f32 %v3488_v50, %v3670_v52 }
 0x298   : > { %v1269_v63 = vadd.f32 1e-05, %v1236_v34  ;;  %v1248_v34 = vsub.f32 %v3469_v33, %v3670_v52 }
 0x29a   : > { %2722 = vrsqrt.f32 %v1269_v63  ;;  %vm1276_vm11 = vweird.f32 %v1269_v63 }
 0x2a0   : > { %v2723_v8 = vpop.eup %2722 }
 0x2a1   : > { %v1271_v32 = vmul.f32 %v2723_v8, %v1269_v63  ;;  %vm1277_vm10 = vweird.f32 %v2723_v8 }
 0x2a2   : > { %vm1278_vm12 = vmor %vm1276_vm11, %vm1277_vm10 }
 0x2a3   : > { %v1272_v54 = vmul.f32 %v2723_v8, %v1271_v32 }
 0x2a5   : > { %v1273_v37 = vmul.f32 0.5, %v1272_v54 }
 0x2a7   : > { %v1274_v53 = vsub.f32 1.5, %v1273_v37 }
 0x2a9   : > { %v1275_v4 = vmul.f32 %v2723_v8, %v1274_v53  ;;  %v1243_v53 = vsub.f32 %v3423_v7, %v3670_v52  ;;  %v1249_v7 = vsub.f32 %v3478_v36, %v3670_v52  ;;  %v1259_v36 = vsub.f32 %v3570_v19, %v3670_v52 }
 0x2ab   : > { %v3702_v0 = vsel %vm1278_vm12, %v2723_v8, %v1275_v4 }
 0x2ac   : > { %v3709_v3 = vmul.f32 %v3702_v0, %v1268_v25  ;;  %v1282_v29 = vmul.f32 %v3702_v0, %v1239_v40  ;;  %v1283_v14 = vmul.f32 %v3702_v0, %v1240_v30  ;;  %v1280_v63 = vmul.f32 %v3702_v0, %v1237_v12 }
 0x2ad   : > { %v1284_v25 = vmul.f32 %v3702_v0, %v1241_v16  ;;  %v1285_v61 = vmul.f32 %v3702_v0, %v1242_v55  ;;  %v1290_v59 = vmul.f32 %v3702_v0, %v1247_v49  ;;  %v1291_v21 = vmul.f32 %v3702_v0, %v1248_v34 }
 0x2ae   : > { %v1314_v58 = vmax.f32 %v1282_v29, 0.0  ;;  %v1315_v46 = vmax.f32 %v1283_v14, 0.0  ;;  %v3727_v8 = vmul.f32 %v3702_v0, %v1265_v9  ;;  %v3730_v33 = vmul.f32 %v3702_v0, %v1266_v17 }
 0x2af   : > { %v3733_v56 = vmul.f32 %v3702_v0, %v1267_v48  ;;  %v1281_v11 = vmul.f32 %v3702_v0, %v1238_v51  ;;  %v1312_v32 = vmax.f32 %v1280_v63, 0.0  ;;  %v1316_v13 = vmax.f32 %v1284_v25, 0.0 }
 0x2b0   : > { %v1346_v38 = vpack.c.bf16 %v1314_v58, %v1314_v58  ;;  %v1347_v45 = vpack.c.bf16 %v1315_v46, %v1315_v46  ;;  %v1317_v47 = vmax.f32 %v1285_v61, 0.0  ;;  %v1244_v9 = vsub.f32 %v3426_v10, %v3670_v52 }
 0x2b1   : > { %v1313_v43 = vmax.f32 %v1281_v11, 0.0  ;;  %v1344_v4 = vpack.c.bf16 %v1312_v32, %v1312_v32  ;;  %v1245_v17 = vsub.f32 %v3440_v41, %v3670_v52  ;;  %v1322_v57 = vmax.f32 %v1290_v59, 0.0 }
 0x2b2   : > { %v1410_v54 = vunpack.c.l.b16 %v1346_v38  ;;  %v1411_v37 = vunpack.c.l.b16 %v1347_v45  ;;  %v1246_v40 = vsub.f32 %v3449_v6, %v3670_v52  ;;  %v1323_v23 = vmax.f32 %v1291_v21, 0.0 }
 0x2b3   : > { %v1345_v5 = vpack.c.bf16 %v1313_v43, %v1313_v43  ;;  %v1408_v30 = vunpack.c.l.b16 %v1344_v4  ;;  %v1348_v10 = vpack.c.bf16 %v1316_v13, %v1316_v13  ;;  %v1349_v41 = vpack.c.bf16 %v1317_v47, %v1317_v47 }
 0x2b4   : > { %v3742_v48 = vpack.c.b16 %v1411_v37, %v1410_v54  ;;  %v1251_v12 = vsub.f32 %v3500_v22, %v3670_v52  ;;  %v1253_v6 = vsub.f32 %v3518_v60, %v3670_v52  ;;  %v1254_v16 = vsub.f32 %v3526_v1, %v3670_v52 }
 0x2b5   : > { %v1409_v55 = vunpack.c.l.b16 %v1345_v5  ;;  %v1260_v29 = vsub.f32 %v3580_v62, %v3670_v52  ;;  %v1288_v14 = vmul.f32 %v3702_v0, %v1245_v17  ;;  %v1354_v49 = vpack.c.bf16 %v1322_v57, %v1322_v57 }
 0x2b6   : > { %1666 = vrot.lane.b32.xlu1 %v3742_v48, %s2766_s18  ;;  %v1355_v63 = vpack.c.bf16 %v1323_v23, %v1323_v23  ;;  %v1412_v22 = vunpack.c.l.b16 %v1348_v10  ;;  %v1413_v58 = vunpack.c.l.b16 %v1349_v41  ;;  %v1252_v60 = vsub.f32 %v3504_v18, %v3670_v52 }
 0x2b7   : > { %v3763_v34 = vpack.c.b16 %v1409_v55, %v1408_v30  ;;  %v1255_v1 = vsub.f32 %v3353_v44, %v3670_v52  ;;  %v1286_v46 = vmul.f32 %v3702_v0, %v1243_v53  ;;  %v3771_v19 = vmul.f32 %v3702_v0, %v1249_v7 }
 0x2b8   : > { %v1296_v62 = vmul.f32 %v3702_v0, %v1253_v6  ;;  %v1297_v25 = vmul.f32 %v3702_v0, %v1254_v16  ;;  %v3776_v61 = vmul.f32 %v3702_v0, %v1259_v36  ;;  %v3779_v28 = vmul.f32 %v3702_v0, %v1260_v29 }
 0x2b9   : > { %1664 = vrot.lane.b32.xlu2 %v3763_v34, %s2766_s18  ;;  %v1418_v18 = vunpack.c.l.b16 %v1354_v49  ;;  %v1460_v51 = vshll.u32 %v3763_v34, 16  ;;  %v3784_v59 = vpack.c.b16 %v1413_v58, %v1412_v22  ;;  %v1467_v38 = vshll.u32 %v3742_v48, 16 }
 0x2ba   : > { %v1419_v45 = vunpack.c.l.b16 %v1355_v63  ;;  %v1289_v21 = vmul.f32 %v3702_v0, %v1246_v40  ;;  %v1320_v11 = vmax.f32 %v1288_v14, 0.0  ;;  %v1287_v32 = vmul.f32 %v3702_v0, %v1244_v9 }
 0x2bb   : > { %v1457_v54 = vshrl.u32 %v3763_v34, 16  ;;  %v1600_v37 = vrot.slane %v1460_v51, 1  ;;  %v1474_v13 = vshll.u32 %v3784_v59, 16  ;;  %v1464_v47 = vshrl.u32 %v3742_v48, 16 }
 0x2bc   : > { %v1602_v53 = vrot.slane %v1467_v38, 1  ;;  %v1321_v43 = vmax.f32 %v1289_v21, 0.0  ;;  %v1352_v4 = vpack.c.bf16 %v1320_v11, %v1320_v11  ;;  %v1318_v17 = vmax.f32 %v1286_v46, 0.0 }
 0x2bd   : > { %v1601_v57 = vor.u32 %v1600_v37, %v1457_v54  ;;  %v1471_v9 = vshrl.u32 %v3784_v59, 16  ;;  %v1604_v40 = vrot.slane %v1474_v13, 1  ;;  %v1319_v5 = vmax.f32 %v1287_v32, 0.0 }
 0x2be   : > { %v1603_v30 = vor.u32 %v1602_v53, %v1464_v47  ;;  %v1353_v23 = vpack.c.bf16 %v1321_v43, %v1321_v43  ;;  %v1416_v7 = vunpack.c.l.b16 %v1352_v4  ;;  %v1350_v10 = vpack.c.bf16 %v1318_v17, %v1318_v17 }
 0x2bf   : > { %v1648_v6 = vsel %vm2840_vm2, %v1601_v57, 0  ;;  %v1605_v16 = vor.u32 %v1604_v40, %v1471_v9  ;;  %v1351_v55 = vpack.c.bf16 %v1319_v5, %v1319_v5  ;;  %v3807_v36 = vpack.c.b16 %v1419_v45, %v1418_v18 }
 0x2c0   : > { %1712 = vrot.lane.b32.xlu0 %v1648_v6, %s2767_s19  ;;  %v1649_v29 = vsel %vm2840_vm2, %v1603_v30, 0  ;;  %v1417_v14 = vunpack.c.l.b16 %v1353_v23  ;;  %v1414_v49 = vunpack.c.l.b16 %v1350_v10  ;;  %v1294_v63 = vmul.f32 %v3702_v0, %v1251_v12 }
 0x2c1   : > { %v1328_v22 = vmax.f32 %v1296_v62, 0.0  ;;  %v1329_v58 = vmax.f32 %v1297_v25, 0.0  ;;  %v1650_v46 = vsel %vm2840_vm2, %v1605_v16, 0  ;;  %1714 = vrot.lane.b32.xlu2 %v1649_v29, %s2767_s19  ;;  %v1415_v21 = vunpack.c.l.b16 %v1351_v55 }
 0x2c2   : > { %1716 = vrot.lane.b32.xlu1 %v1650_v46, %s2767_s19  ;;  %v3817_v18 = vpack.c.b16 %v1417_v14, %v1416_v7  ;;  %v1295_v45 = vmul.f32 %v3702_v0, %v1252_v60  ;;  %v1326_v11 = vmax.f32 %v1294_v63, 0.0  ;;  %v1293_v12 = vmul.f32 %v3702_v0, %v1250_v24 }
 0x2c3   : > { %v1256_v62 = vsub.f32 %v3545_v42, %v3670_v52  ;;  %v1334_v25 = vmax.f32 %v3776_v61, 0.0  ;;  %v3827_v32 = vpack.c.b16 %v1415_v21, %v1414_v49  ;;  %v1324_v37 = vmax.f32 %v3771_v19, 0.0 }
 0x2c4   : > { %v1335_v53 = vmax.f32 %v3779_v28, 0.0  ;;  %v1495_v43 = vshll.u32 %v3807_v36, 16  ;;  %v1488_v60 = vshll.u32 %v3817_v18, 16  ;;  %v1327_v4 = vmax.f32 %v1295_v45, 0.0 }
 0x2c5   : > { %v1360_v17 = vpack.c.bf16 %v1328_v22, %v1328_v22  ;;  %v1361_v50 = vpack.c.bf16 %v1329_v58, %v1329_v58  ;;  %v1481_v24 = vshll.u32 %v3827_v32, 16  ;;  %v1325_v57 = vmax.f32 %v1293_v12, 0.0 }
 0x2c6   : > { %v1257_v42 = vsub.f32 %v3557_v31, %v3670_v52  ;;  %v1258_v61 = vsub.f32 %v3567_v35, %v3670_v52  ;;  %v1340_v19 = vmax.f32 %v3727_v8, 0.0  ;;  %v1358_v40 = vpack.c.bf16 %v1326_v11, %v1326_v11 }
 0x2c7   : > { %v1341_v28 = vmax.f32 %v3730_v33, 0.0  ;;  %v1606_v5 = vrot.slane %v1481_v24, 1  ;;  %v1359_v30 = vpack.c.bf16 %v1327_v4, %v1327_v4  ;;  %v1356_v23 = vpack.c.bf16 %v1324_v37, %v1324_v37 }
 0x2c8   : > { %v3842_v7 = vpack.c.bf16 %v1334_v25, %v1334_v25  ;;  %1668 = vrot.lane.b32.xlu0 %v3784_v59, %s2766_s18  ;;  %v1610_v31 = vrot.slane %v1495_v43, 1  ;;  %v1608_v35 = vrot.slane %v1488_v60, 1  ;;  %v1357_v8 = vpack.c.bf16 %v1325_v57, %v1325_v57 }
 0x2c9   : > { %v3850_v10 = vpack.c.bf16 %v1335_v53, %v1335_v53  ;;  %v1424_v33 = vunpack.c.l.b16 %v1360_v17  ;;  %v1425_v6 = vunpack.c.l.b16 %v1361_v50  ;;  %1670 = vrot.lane.b32.xlu2 %v3827_v32, %s2766_s18  ;;  %v1478_v16 = vshrl.u32 %v3827_v32, 16 }
 0x2ca   : > { %v1372_v55 = vpack.c.bf16 %v1340_v19, %v1340_v19  ;;  %1672 = vrot.lane.b32.xlu1 %v3817_v18, %s2766_s18  ;;  %v1492_v29 = vshrl.u32 %v3807_v36, 16  ;;  %v1485_v14 = vshrl.u32 %v3817_v18, 16  ;;  %v1422_v49 = vunpack.c.l.b16 %v1358_v40 }
 0x2cb   : > { %v1607_v63 = vor.u32 %v1606_v5, %v1478_v16  ;;  %v1423_v22 = vunpack.c.l.b16 %v1359_v30  ;;  %v1420_v58 = vunpack.c.l.b16 %v1356_v23  ;;  %v1421_v46 = vunpack.c.l.b16 %v1357_v8 }
 0x2cc   : > { %v1261_v21 = vsub.f32 %v3595_v27, %v3670_v52  ;;  %v1373_v45 = vpack.c.bf16 %v1341_v28, %v1341_v28  ;;  %v1611_v11 = vor.u32 %v1610_v31, %v1492_v29  ;;  %v1609_v12 = vor.u32 %v1608_v35, %v1485_v14 }
 0x2cd   : > { %v3863_v25 = vpack.c.b16 %v1425_v6, %v1424_v33  ;;  %v1300_v37 = vmul.f32 %v3702_v0, %v1257_v42  ;;  %v1301_v53 = vmul.f32 %v3702_v0, %v1258_v61  ;;  %v1298_v4 = vmul.f32 %v3702_v0, %v1255_v1 }
 0x2ce   : > { %v1262_v17 = vsub.f32 %v3605_v26, %v3670_v52  ;;  %v1430_v50 = vunpack.c.l.b16 %v3842_v7  ;;  %v1431_v27 = vunpack.c.l.b16 %v3850_v10  ;;  %v1436_v57 = vunpack.c.l.b16 %v1372_v55 }
 0x2cf   : > { %v1651_v19 = vsel %vm2840_vm2, %v1607_v63, 0  ;;  %v3877_v40 = vpack.c.b16 %v1423_v22, %v1422_v49  ;;  %v3879_v42 = vpack.c.b16 %v1421_v46, %v1420_v58  ;;  %v1299_v61 = vmul.f32 %v3702_v0, %v1256_v62 }
 0x2d0   : > { %v1437_v44 = vunpack.c.l.b16 %v1373_v45  ;;  %1718 = vrot.lane.b32.xlu0 %v1651_v19, %s2767_s19  ;;  %v1653_v26 = vsel %vm2840_vm2, %v1611_v11, 0  ;;  %v1652_v1 = vsel %vm2840_vm2, %v1609_v12, 0  ;;  %v1330_v28 = vmax.f32 %v1298_v4, 0.0 }
 0x2d1   : > { %1720 = vrot.lane.b32.xlu2 %v1652_v1, %s2767_s19  ;;  %v1516_v5 = vshll.u32 %v3863_v25, 16  ;;  %v1332_v30 = vmax.f32 %v1300_v37, 0.0  ;;  %v1333_v23 = vmax.f32 %v1301_v53, 0.0  ;;  %v1331_v31 = vmax.f32 %v1299_v61, 0.0 }
 0x2d2   : > { %v3891_v62 = vrot.slane %v1457_v54, 7  ;;  %v3895_v35 = vrot.slane %v1464_v47, 7  ;;  %1722 = vrot.lane.b32.xlu1 %v1653_v26, %s2767_s19  ;;  %v1362_v8 = vpack.c.bf16 %v1330_v28, %v1330_v28  ;;  %v1306_v33 = vmul.f32 %v3702_v0, %v1263_v20  ;;  %v2705_v28 = vld [vmem:[%s4706_s2 + $0xc] sm:$0xff] }
 0x2d3   : > { %v3904_v6 = vrot.slane %v1471_v9, 7  ;;  %v1502_v55 = vshll.u32 %v3879_v42, 16  ;;  %v1509_v54 = vshll.u32 %v3877_v40, 16  ;;  %v1363_v49 = vpack.c.bf16 %v1331_v31, %v1331_v31  ;;  %2078 = vmatpush.bf16.msrb.mxu1 %v2705_v28 }
 0x2d4   : > { %v3908_v63 = vrot.slane %v1492_v29, 7  ;;  %v3910_v47 = vrot.slane %v1485_v14, 7  ;;  %v1513_v22 = vshrl.u32 %v3863_v25, 16  ;;  %v1307_v15 = vmul.f32 %v3702_v0, %v1264_v39 }
 0x2d5   : > { %v1616_v20 = vrot.slane %v1516_v5, 1  ;;  %v1364_v9 = vpack.c.bf16 %v1332_v30, %v1332_v30  ;;  %v1365_v58 = vpack.c.bf16 %v1333_v23, %v1333_v23  ;;  %v1426_v46 = vunpack.c.l.b16 %v1362_v8  ;;  %v2706_v30 = vld [vmem:[%s4706_s2] sm:$0xff]  ;;  %v2707_v23 = vld [vmem:[%s4706_s2 + $0x18] sm:$0xff] }
 0x2d6   : > { %v1427_v45 = vunpack.c.l.b16 %v1363_v49  ;;  %v1338_v11 = vmax.f32 %v1306_v33, 0.0  ;;  %v1339_v12 = vmax.f32 %v1307_v15, 0.0  ;;  %v1304_v29 = vmul.f32 %v3702_v0, %v1261_v21  ;;  %1880 = vmatpush.bf16.msrb.mxu3 %v2706_v30  ;;  %1982 = vmatpush.bf16.msrb.mxu0 %v2707_v23 }
 0x2d7   : > { %v1612_v14 = vrot.slane %v1502_v55, 1  ;;  %v1614_v37 = vrot.slane %v1509_v54, 1  ;;  %v1305_v2 = vmul.f32 %v3702_v0, %v1262_v17  ;;  %v3925_v52 = vpack.c.b16 %v1437_v44, %v1436_v57 }
 0x2d8   : > { %1674 = vrot.lane.b32.xlu0 %v3807_v36, %s2766_s18  ;;  %v1506_v39 = vshrl.u32 %v3877_v40, 16  ;;  %v1370_v53 = vpack.c.bf16 %v1338_v11, %v1338_v11  ;;  %v1371_v4 = vpack.c.bf16 %v1339_v12, %v1339_v12  ;;  %v1336_v19 = vmax.f32 %v1304_v29, 0.0 }
 0x2d9   : > { %1676 = vrot.lane.b32.xlu2 %v3879_v42, %s2766_s18  ;;  %v1499_v21 = vshrl.u32 %v3879_v42, 16  ;;  %v1428_v61 = vunpack.c.l.b16 %v1364_v9  ;;  %v1429_v26 = vunpack.c.l.b16 %v1365_v58  ;;  %v1337_v1 = vmax.f32 %v1305_v2, 0.0 }
 0x2da   : > { %1678 = vrot.lane.b32.xlu1 %v3877_v40, %s2766_s18  ;;  %v3935_v0 = vpack.c.b16 %v1427_v45, %v1426_v46  ;;  %v1434_v17 = vunpack.c.l.b16 %v1370_v53  ;;  %v1435_v57 = vunpack.c.l.b16 %v1371_v4  ;;  %v1368_v44 = vpack.c.bf16 %v1336_v19, %v1336_v19 }
 0x2db   : > { %v1613_v31 = vor.u32 %v1612_v14, %v1499_v21  ;;  %v1617_v8 = vor.u32 %v1616_v20, %v1513_v22  ;;  %v1615_v33 = vor.u32 %v1614_v37, %v1506_v39  ;;  %v1369_v49 = vpack.c.bf16 %v1337_v1, %v1337_v1 }
 0x2dc   : > { %v3950_v15 = vpack.c.b16 %v1431_v27, %v1430_v50  ;;  %v3952_v9 = vpack.c.b16 %v1435_v57, %v1434_v17  ;;  %v1432_v58 = vunpack.c.l.b16 %v1368_v44  ;;  %v1342_v46 = vmax.f32 %v3733_v56, 0.0 }
 0x2dd   : > { %v1480_v45 = vrot.slane %v1478_v16, 7  ;;  %v3957_v11 = vpack.c.b16 %v1429_v26, %v1428_v61  ;;  %v1433_v20 = vunpack.c.l.b16 %v1369_v49  ;;  %v1343_v7 = vmax.f32 %v3709_v3, 0.0 }
 0x2de   : > { %v1501_v12 = vrot.slane %v1499_v21, 7  ;;  %v1515_v10 = vrot.slane %v1513_v22, 7  ;;  %v1520_v50 = vshrl.u32 %v3935_v0, 16  ;;  %v1374_v27 = vpack.c.bf16 %v1342_v46, %v1342_v46 }
 0x2df   : > { %v1654_v29 = vsel %vm2840_vm2, %v1613_v31, 0  ;;  %v3963_v14 = vpack.c.b16 %v1433_v20, %v1432_v58  ;;  %v1375_v56 = vpack.c.bf16 %v1343_v7, %v1343_v7  ;;  %v3968_v16 = vor.u32 %v1460_v51, %v3891_v62 }
 0x2e0   : > { %1724 = vrot.lane.b32.xlu0 %v1654_v29, %s2767_s19  ;;  %v1656_v3 = vsel %vm2840_vm2, %v1617_v8, 0  ;;  %v1655_v22 = vsel %vm2840_vm2, %v1615_v33, 0  ;;  %v1534_v37 = vshrl.u32 %v3950_v15, 16  ;;  %v1438_v2 = vunpack.c.l.b16 %v1374_v27 }
 0x2e1   : > { %1726 = vrot.lane.b32.xlu2 %v1655_v22, %s2767_s19  ;;  %v1527_v53 = vshrl.u32 %v3957_v11, 16  ;;  %v1541_v4 = vshrl.u32 %v3963_v14, 16  ;;  %v1548_v34 = vshrl.u32 %v3952_v9, 16  ;;  %v1439_v51 = vunpack.c.l.b16 %v1375_v56 }
 0x2e2   : > { %1728 = vrot.lane.b32.xlu1 %v1656_v3, %s2767_s19  ;;  %v1508_v62 = vrot.slane %v1506_v39, 7  ;;  %v1522_v19 = vrot.slane %v1520_v50, 7  ;;  %v3983_v21 = vor.u32 %v1481_v24, %v1480_v45  ;;  %v3988_v61 = vor.u32 %v1467_v38, %v3895_v35 }
 0x2e3   : > { %v1523_v26 = vshll.u32 %v3935_v0, 16  ;;  %v1555_v1 = vshrl.u32 %v3925_v52, 16  ;;  %v1455_v17 = vpack.c.b16 %v1439_v51, %v1438_v2  ;;  %v3994_v57 = vor.u32 %v1502_v55, %v1501_v12 }
 0x2e4   : > { %v1537_v39 = vshll.u32 %v3950_v15, 16  ;;  %v1530_v32 = vshll.u32 %v3957_v11, 16  ;;  %v1543_v24 = vrot.slane %v1541_v4, 7  ;;  %v4001_v48 = vor.u32 %v1474_v13, %v3904_v6 }
 0x2e5   : > { %v1536_v38 = vrot.slane %v1534_v37, 7  ;;  %v1529_v35 = vrot.slane %v1527_v53, 7  ;;  %v1550_v44 = vrot.slane %v1548_v34, 7  ;;  %v1562_v28 = vshrl.u32 %v1455_v17, 16 }
 0x2e6   : > { %v1544_v30 = vshll.u32 %v3963_v14, 16  ;;  %v4007_v42 = vor.u32 %v1488_v60, %v3910_v47  ;;  %v4009_v55 = vor.u32 %v1523_v26, %v1522_v19  ;;  %v4014_v23 = vor.u32 %v1495_v43, %v3908_v63 }
 0x2e7   : > { %v1618_v59 = vrot.slane %v1523_v26, 1  ;;  %v1557_v13 = vrot.slane %v1555_v1, 7  ;;  %v1564_v6 = vrot.slane %v1562_v28, 7  ;;  %v4018_v31 = vor.u32 %v1509_v54, %v1508_v62 }
 0x2e8   : > { %1680 = vrot.lane.b32.xlu0 %v3863_v25, %s2766_s18  ;;  %v1620_v18 = vrot.slane %v1530_v32, 1  ;;  %v1551_v60 = vshll.u32 %v3952_v9, 16  ;;  %v1565_v47 = vshll.u32 %v1455_v17, 16  ;;  %v4023_v8 = vor.u32 %v1544_v30, %v1543_v24 }
 0x2e9   : > { %1682 = vrot.lane.b32.xlu2 %v3935_v0, %s2766_s18  ;;  %v1622_v36 = vrot.slane %v1537_v39, 1  ;;  %v1558_v43 = vshll.u32 %v3925_v52, 16  ;;  %v4030_v40 = vor.u32 %v1516_v5, %v1515_v10  ;;  %v4032_v54 = vor.u32 %v1530_v32, %v1529_v35 }
 0x2ea   : > { %1684 = vrot.lane.b32.xlu1 %v3957_v11, %s2766_s18  ;;  %v4036_v63 = vor.u32 %v1565_v47, %v1564_v6  ;;  %v4038_v33 = vor.u32 %v1537_v39, %v1536_v38  ;;  %v4040_v49 = vor.u32 %v1551_v60, %v1550_v44  ;;  %v1619_v58 = vor.u32 %v1618_v59, %v1520_v50 }
 0x2eb   : > { %v4042_v0 = vor.u32 %v1558_v43, %v1557_v13  ;;  %v1621_v46 = vor.u32 %v1620_v18, %v1527_v53  ;;  %v1623_v45 = vor.u32 %v1622_v36, %v1534_v37  ;;  %v1624_v20 = vrot.slane %v1544_v30, 1 }
 0x2ec   : > { %v1657_v25 = vsel %vm2840_vm2, %v1619_v58, 0  ;;  %v1626_v7 = vrot.slane %v1551_v60, 1  ;;  %v1628_v12 = vrot.slane %v1558_v43, 1  ;;  %v1585_v53 = vsel %vm2985_vm6, 0, %v3988_v61 }
 0x2ed   : > { %v1658_v5 = vsel %vm2840_vm2, %v1621_v46, 0  ;;  %v1659_v11 = vsel %vm2840_vm2, %v1623_v45, 0  ;;  %v1625_v10 = vor.u32 %v1624_v20, %v1541_v4  ;;  %v1584_v41 = vsel %vm2985_vm6, 0, %v3968_v16 }
 0x2ee   : > { %v1627_v50 = vor.u32 %v1626_v7, %v1548_v34  ;;  %v1629_v27 = vor.u32 %v1628_v12, %v1555_v1  ;;  %v1586_v61 = vsel %vm2985_vm6, 0, %v4001_v48  ;;  %v1587_v24 = vsel %vm2985_vm6, 0, %v3983_v21 }
 0x2ef   : > { %v1660_v29 = vsel %vm2840_vm2, %v1625_v10, 0  ;;  %v1588_v44 = vsel %vm2985_vm6, 0, %v4007_v42  ;;  %v1589_v13 = vsel %vm2985_vm6, 0, %v4014_v23  ;;  %v1590_v36 = vsel %vm2985_vm6, 0, %v3994_v57 }
 0x2f0   : > { %1730 = vrot.lane.b32.xlu0 %v1657_v25, %s2767_s19  ;;  %v1661_v56 = vsel %vm2840_vm2, %v1627_v50, 0  ;;  %v1591_v46 = vsel %vm2985_vm6, 0, %v4018_v31 }
 0x2f1   : > { %1732 = vrot.lane.b32.xlu2 %v1658_v5, %s2767_s19 }
 0x2f2   : > { %1734 = vrot.lane.b32.xlu1 %v1659_v11, %s2767_s19  ;;  %v1592_v11 = vsel %vm2985_vm6, 0, %v4030_v40 }
 0x2f8   : > { %1686 = vrot.lane.b32.xlu0 %v3950_v15, %s2766_s18  ;;  %v1662_v15 = vsel %vm2840_vm2, %v1629_v27, 0  ;;  %v1593_v27 = vsel %vm2985_vm6, 0, %v4009_v55  ;;  %v1594_v55 = vsel %vm2985_vm6, 0, %v4032_v54 }
 0x2f9   : > { %1688 = vrot.lane.b32.xlu2 %v3963_v14, %s2766_s18  ;;  %v1630_v14 = vrot.slane %v1565_v47, 1 }
 0x2fa   : > { %1690 = vrot.lane.b32.xlu1 %v3952_v9, %s2766_s18 }
 0x2fb   : > { %v1631_v9 = vor.u32 %v1630_v14, %v1562_v28 }
 0x2fd   : > { %v1663_v3 = vsel %vm2840_vm2, %v1631_v9, 0 }
 0x300   : > { %1736 = vrot.lane.b32.xlu0 %v1660_v29, %s2767_s19 }
 0x301   : > { %1738 = vrot.lane.b32.xlu2 %v1661_v56, %s2767_s19 }
 0x302   : > { %1740 = vrot.lane.b32.xlu1 %v1662_v15, %s2767_s19 }
 0x308   : > { %1692 = vrot.lane.b32.xlu0 %v3925_v52, %s2766_s18 }
 0x309   : > { %1694 = vrot.lane.b32.xlu2 %v1455_v17, %s2766_s18 }
 0x310   : > { %1742 = vrot.lane.b32.xlu0 %v1663_v3, %s2767_s19 }
 0x313   : > { %v1665_v22 = vpop.permute.xlu2 %1664 }
 0x314   : > { %v1746_v52 = vsel %vm610_vm7, %v1584_v41, %v1665_v22 }
 0x31b   : > { %v1715_v4 = vpop.permute.xlu2 %1714 }
 0x323   : > { %v1671_v16 = vpop.permute.xlu2 %1670 }
 0x324   : > { %v1755_v48 = vsel %vm610_vm7, %v1587_v24, %v1671_v16 }
 0x328   : > { %v1667_v37 = vpop.permute.xlu1 %1666 }
 0x329   : > { %v1749_v34 = vsel %vm610_vm7, %v1585_v53, %v1667_v37 }
 0x32a   : > { %v1795_v51 = vsel %vm659_vm8, %v1749_v34, %v1715_v4 }
 0x32b   : > { %2663 = vmatmul.msk.bf16.vlgmr.msrb.gmra.mxu0 %vm708_vm9, %v1795_v51  ;;  %v1721_v30 = vpop.permute.xlu2 %1720 }
 0x332   : > { %v1713_v62 = vpop.permute.xlu0 %1712 }
 0x333   : > { %v1793_v19 = vsel %vm659_vm8, %v1746_v52, %v1713_v62  ;;  %v1677_v60 = vpop.permute.xlu2 %1676 }
 0x334   : > { %2641 = vmatmul.msk.bf16.vlgmr.msrb.gmra.mxu3 %vm708_vm9, %v1793_v19  ;;  %2682 = vmatmul.msk.bf16.vlgmr.msrb.gmra.mxu1 %vm708_vm9, %v1793_v19  ;;  %v1717_v1 = vpop.permute.xlu1 %1716  ;;  %v1764_v43 = vsel %vm610_vm7, %v1590_v36, %v1677_v60 }
 0x33a   : > { %v1669_v26 = vpop.permute.xlu0 %1668 }
 0x33b   : > { %v1752_v17 = vsel %vm610_vm7, %v1586_v61, %v1669_v26  ;;  %v1727_v25 = vpop.permute.xlu2 %1726 }
 0x33c   : > { %v1797_v39 = vsel %vm659_vm8, %v1752_v17, %v1717_v1  ;;  %v1673_v35 = vpop.permute.xlu1 %1672  ;;  %v1595_v1 = vsel %vm2985_vm6, 0, %v4038_v33 }
 0x33d   : > { %2664 = vmatmul.msk.bf16.gmra.mxu0 %vm708_vm9, %v1797_v39  ;;  %v1758_v28 = vsel %vm610_vm7, %v1588_v44, %v1673_v35 }
 0x33e   : > { %v1801_v21 = vsel %vm659_vm8, %v1758_v28, %v1721_v30 }
 0x342   : > { %v1719_v32 = vpop.permute.xlu0 %1718 }
 0x343   : > { %v1799_v38 = vsel %vm659_vm8, %v1755_v48, %v1719_v32  ;;  %v1683_v10 = vpop.permute.xlu2 %1682 }
 0x344   : > { %2642 = vmatmul.msk.bf16.gmra.mxu3 %vm708_vm9, %v1795_v51  ;;  %2683 = vmatmul.msk.bf16.gmra.mxu1 %vm708_vm9, %v1795_v51  ;;  %v1723_v18 = vpop.permute.xlu1 %1722  ;;  %v1773_v40 = vsel %vm610_vm7, %v1593_v27, %v1683_v10 }
 0x34a   : > { %v1675_v59 = vpop.permute.xlu0 %1674 }
 0x34b   : > { %v1761_v6 = vsel %vm610_vm7, %v1589_v13, %v1675_v59  ;;  %v1733_v34 = vpop.permute.xlu2 %1732 }
 0x34c   : > { %v1803_v42 = vsel %vm659_vm8, %v1761_v6, %v1723_v18  ;;  %v1679_v58 = vpop.permute.xlu1 %1678  ;;  %v1596_v18 = vsel %vm2985_vm6, 0, %v4023_v8 }
 0x34d   : > { %2665 = vmatmul.msk.bf16.gmra.mxu0 %vm708_vm9, %v1799_v38  ;;  %v1767_v45 = vsel %vm610_vm7, %v1591_v46, %v1679_v58 }
 0x34e   : > { %v1807_v57 = vsel %vm659_vm8, %v1767_v45, %v1727_v25 }
 0x352   : > { %v1725_v47 = vpop.permute.xlu0 %1724 }
 0x353   : > { %v1805_v23 = vsel %vm659_vm8, %v1764_v43, %v1725_v47  ;;  %v1689_v59 = vpop.permute.xlu2 %1688 }
 0x354   : > { %2643 = vmatmul.msk.bf16.gmra.mxu3 %vm708_vm9, %v1797_v39  ;;  %2684 = vmatmul.msk.bf16.gmra.mxu1 %vm708_vm9, %v1797_v39  ;;  %v1729_v7 = vpop.permute.xlu1 %1728  ;;  %v1782_v47 = vsel %vm610_vm7, %v1596_v18, %v1689_v59 }
 0x35a   : > { %v1681_v5 = vpop.permute.xlu0 %1680 }
 0x35b   : > { %v1770_v20 = vsel %vm610_vm7, %v1592_v11, %v1681_v5  ;;  %v1597_v5 = vsel %vm2985_vm6, 0, %v4040_v49 }
 0x35c   : > { %v1809_v31 = vsel %vm659_vm8, %v1770_v20, %v1729_v7  ;;  %v1685_v9 = vpop.permute.xlu1 %1684 }
 0x35d   : > { %2666 = vmatmul.msk.bf16.gmra.mxu0 %vm708_vm9, %v1801_v21  ;;  %v1776_v22 = vsel %vm610_vm7, %v1594_v55, %v1685_v9 }
 0x35e   : > { %v1813_v51 = vsel %vm659_vm8, %v1776_v22, %v1733_v34 }
 0x362   : > { %v1731_v50 = vpop.permute.xlu0 %1730 }
 0x363   : > { %v1811_v29 = vsel %vm659_vm8, %v1773_v40, %v1731_v50 }
 0x364   : > { %2644 = vmatmul.msk.bf16.gmra.mxu3 %vm708_vm9, %v1799_v38  ;;  %2685 = vmatmul.msk.bf16.gmra.mxu1 %vm708_vm9, %v1799_v38  ;;  %v1735_v24 = vpop.permute.xlu1 %1734 }
 0x36a   : > { %v1687_v54 = vpop.permute.xlu0 %1686 }
 0x36b   : > { %v1779_v17 = vsel %vm610_vm7, %v1595_v1, %v1687_v54 }
 0x36c   : > { %v1815_v38 = vsel %vm659_vm8, %v1779_v17, %v1735_v24  ;;  %v1691_v8 = vpop.permute.xlu1 %1690 }
 0x36d   : > { %2667 = vmatmul.msk.bf16.gmra.mxu0 %vm708_vm9, %v1803_v42  ;;  %v1785_v11 = vsel %vm610_vm7, %v1597_v5, %v1691_v8 }
 0x372   : > { %v1737_v13 = vpop.permute.xlu0 %1736 }
 0x373   : > { %v1817_v36 = vsel %vm659_vm8, %v1782_v47, %v1737_v13 }
 0x374   : > { %2645 = vmatmul.msk.bf16.gmra.mxu3 %vm708_vm9, %v1801_v21  ;;  %2686 = vmatmul.msk.bf16.gmra.mxu1 %vm708_vm9, %v1801_v21  ;;  %v1741_v34 = vpop.permute.xlu1 %1740 }
 0x37a   : > { %v1693_v49 = vpop.permute.xlu0 %1692 }
 0x37d   : > { %2668 = vmatmul.msk.bf16.gmra.mxu0 %vm708_vm9, %v1805_v23 }
 0x382   : > { %v1743_v17 = vpop.permute.xlu0 %1742 }
 0x384   : > { %2646 = vmatmul.msk.bf16.gmra.mxu3 %vm708_vm9, %v1803_v42  ;;  %2687 = vmatmul.msk.bf16.gmra.mxu1 %vm708_vm9, %v1803_v42 }
 0x38d   : > { %2669 = vmatmul.msk.bf16.gmra.mxu0 %vm708_vm9, %v1807_v57 }
 0x394   : > { %2647 = vmatmul.msk.bf16.gmra.mxu3 %vm708_vm9, %v1805_v23  ;;  %2688 = vmatmul.msk.bf16.gmra.mxu1 %vm708_vm9, %v1805_v23 }
 0x39d   : > { %2670 = vmatmul.msk.bf16.gmra.mxu0 %vm708_vm9, %v1809_v31 }
 0x3a4   : > { %2648 = vmatmul.msk.bf16.gmra.mxu3 %vm708_vm9, %v1807_v57  ;;  %2689 = vmatmul.msk.bf16.gmra.mxu1 %vm708_vm9, %v1807_v57 }
 0x3a8   : > { %v1984_v12 = vpop.f32.mrf.mxu0 }
 0x3ad   : > { %2671 = vmatmul.msk.bf16.gmra.mxu0 %vm708_vm9, %v1811_v29 }
 0x3b0   : > { %v1986_v56 = vpop.f32.mrf.mxu0 }
 0x3b1   : > { %v2080_v15 = vpop.f32.mrf.mxu1 }
 0x3b2   : > { %v4149_v14 = vadd.f32 %v2080_v15, %v1984_v12  ;;  %v1739_v12 = vpop.permute.xlu2 %1738 }
 0x3b3   : > { %v1819_v50 = vsel %vm659_vm8, %v1785_v11, %v1739_v12 }
 0x3b4   : > { %2649 = vmatmul.msk.bf16.gmra.mxu3 %vm708_vm9, %v1809_v31  ;;  %2690 = vmatmul.msk.bf16.gmra.mxu1 %vm708_vm9, %v1809_v31 }
 0x3b7   : > { %v1882_v3 = vpop.f32.mrf.mxu3 }
 0x3b9   : > { %v2082_v37 = vpop.f32.mrf.mxu1 }
 0x3ba   : > { %v4157_v53 = vadd.f32 %v2082_v37, %v1986_v56  ;;  %v1989_v4 = vpop.f32.mrf.mxu0  ;;  %v1695_v1 = vpop.permute.xlu2 %1694 }
 0x3bd   : > { %2672 = vmatmul.msk.bf16.gmra.mxu0 %vm708_vm9, %v1813_v51 }
 0x3bf   : > { %v1884_v41 = vpop.f32.mrf.mxu3 }
 0x3c1   : > { %v2085_v52 = vpop.f32.mrf.mxu1 }
 0x3c2   : > { %v2086_v62 = vadd.f32 %v2085_v52, %v1882_v3  ;;  %v1991_v19 = vpop.f32.mrf.mxu0  ;;  %v1598_v3 = vsel %vm2985_vm6, 0, %v4042_v0 }
 0x3c3   : > { %v1788_v55 = vsel %vm610_vm7, %v1598_v3, %v1693_v49 }
 0x3c4   : > { %v4161_v61 = vadd.f32 %v2086_v62, %v1989_v4  ;;  %2650 = vmatmul.msk.bf16.gmra.mxu3 %vm708_vm9, %v1811_v29  ;;  %2691 = vmatmul.msk.bf16.gmra.mxu1 %vm708_vm9, %v1811_v29 }
 0x3c7   : > { %v1887_v26 = vpop.f32.mrf.mxu3 }
 0x3c9   : > { %v2087_v39 = vpop.f32.mrf.mxu1 }
 0x3ca   : > { %v2088_v16 = vadd.f32 %v2087_v39, %v1884_v41  ;;  %v1994_v32 = vpop.f32.mrf.mxu0  ;;  %v1821_v41 = vsel %vm659_vm8, %v1788_v55, %v1741_v34 }
 0x3cc   : > { %v4169_v48 = vadd.f32 %v2088_v16, %v1991_v19  ;;  %v1599_v16 = vsel %vm2985_vm6, 0, %v4036_v63 }
 0x3cd   : > { %2673 = vmatmul.msk.bf16.gmra.mxu0 %vm708_vm9, %v1815_v38 }
 0x3cf   : > { %v1889_v35 = vpop.f32.mrf.mxu3 }
 0x3d1   : > { %v2090_v44 = vpop.f32.mrf.mxu1 }
 0x3d2   : > { %v2091_v28 = vadd.f32 %v2090_v44, %v1887_v26  ;;  %v1996_v30 = vpop.f32.mrf.mxu0 }
 0x3d4   : > { %v4173_v21 = vadd.f32 %v2091_v28, %v1994_v32  ;;  %2651 = vmatmul.msk.bf16.gmra.mxu3 %vm708_vm9, %v1813_v51  ;;  %2692 = vmatmul.msk.bf16.gmra.mxu1 %vm708_vm9, %v1813_v51 }
 0x3d7   : > { %v1892_v33 = vpop.f32.mrf.mxu3 }
 0x3d9   : > { %v2092_v6 = vpop.f32.mrf.mxu1 }
 0x3da   : > { %v2093_v42 = vadd.f32 %v2092_v6, %v1889_v35  ;;  %v1999_v60 = vpop.f32.mrf.mxu0 }
 0x3dc   : > { %v4182_v43 = vadd.f32 %v2093_v42, %v1996_v30 }
 0x3dd   : > { %2674 = vmatmul.msk.bf16.gmra.mxu0 %vm708_vm9, %v1817_v36 }
 0x3df   : > { %v1894_v23 = vpop.f32.mrf.mxu3 }
 0x3e1   : > { %v2095_v58 = vpop.f32.mrf.mxu1 }
 0x3e2   : > { %v2096_v46 = vadd.f32 %v2095_v58, %v1892_v33  ;;  %v2001_v45 = vpop.f32.mrf.mxu0 }
 0x3e4   : > { %v4185_v25 = vadd.f32 %v2096_v46, %v1999_v60  ;;  %2652 = vmatmul.msk.bf16.gmra.mxu3 %vm708_vm9, %v1815_v38  ;;  %2693 = vmatmul.msk.bf16.gmra.mxu1 %vm708_vm9, %v1815_v38  ;;  %v1791_v38 = vsel %vm610_vm7, %v1599_v16, %v1695_v1 }
 0x3e5   : > { %v1823_v35 = vsel %vm659_vm8, %v1791_v38, %v1743_v17 }
 0x3e7   : > { %v1897_v57 = vpop.f32.mrf.mxu3 }
 0x3e9   : > { %v2097_v20 = vpop.f32.mrf.mxu1 }
 0x3ea   : > { %v2098_v7 = vadd.f32 %v2097_v20, %v1894_v23  ;;  %v2004_v31 = vpop.f32.mrf.mxu0 }
 0x3ec   : > { %v4193_v10 = vadd.f32 %v2098_v7, %v2001_v45 }
 0x3ed   : > { %2675 = vmatmul.msk.bf16.gmra.mxu0 %vm708_vm9, %v1819_v50 }
 0x3ef   : > { %v1899_v27 = vpop.f32.mrf.mxu3 }
 0x3f1   : > { %v2100_v40 = vpop.f32.mrf.mxu1 }
 0x3f2   : > { %v2101_v29 = vadd.f32 %v2100_v40, %v1897_v57  ;;  %v2006_v56 = vpop.f32.mrf.mxu0 }
 0x3f4   : > { %v4197_v15 = vadd.f32 %v2101_v29, %v2004_v31  ;;  %2653 = vmatmul.msk.bf16.gmra.mxu3 %vm708_vm9, %v1817_v36  ;;  %2694 = vmatmul.msk.bf16.gmra.mxu1 %vm708_vm9, %v1817_v36 }
 0x3f7   : > { %v1902_v9 = vpop.f32.mrf.mxu3 }
 0x3f9   : > { %v2102_v22 = vpop.f32.mrf.mxu1 }
 0x3fa   : > { %v2103_v37 = vadd.f32 %v2102_v22, %v1899_v27  ;;  %v2009_v4 = vpop.f32.mrf.mxu0 }
 0x3fc   : > { %v4205_v51 = vadd.f32 %v2103_v37, %v2006_v56 }
 0x3fd   : > { %2676 = vmatmul.msk.bf16.gmra.mxu0 %vm708_vm9, %v1821_v41 }
 0x3ff   : > { %v1904_v52 = vpop.f32.mrf.mxu3 }
 0x401   : > { %v2105_v62 = vpop.f32.mrf.mxu1 }
 0x402   : > { %v2106_v19 = vadd.f32 %v2105_v62, %v1902_v9  ;;  %v2011_v54 = vpop.f32.mrf.mxu0 }
 0x404   : > { %v4209_v26 = vadd.f32 %v2106_v19, %v2009_v4  ;;  %2654 = vmatmul.msk.bf16.gmra.mxu3 %vm708_vm9, %v1819_v50  ;;  %2695 = vmatmul.msk.bf16.gmra.mxu1 %vm708_vm9, %v1819_v50 }
 0x407   : > { %v1907_v0 = vpop.f32.mrf.mxu3 }
 0x409   : > { %v2107_v39 = vpop.f32.mrf.mxu1 }
 0x40a   : > { %v2108_v32 = vadd.f32 %v2107_v39, %v1904_v52  ;;  %v2014_v24 = vpop.f32.mrf.mxu0 }
 0x40c   : > { %v4218_v44 = vadd.f32 %v2108_v32, %v2011_v54 }
 0x40d   : > { %2677 = vmatmul.msk.bf16.gmra.mxu0 %vm708_vm9, %v1823_v35 }
 0x40f   : > { %v1909_v28 = vpop.f32.mrf.mxu3 }
 0x411   : > { %v2110_v30 = vpop.f32.mrf.mxu1 }
 0x412   : > { %v2111_v33 = vadd.f32 %v2110_v30, %v1907_v0  ;;  %v2016_v59 = vpop.f32.mrf.mxu0  ;;  %v2262_v30 = vmul.f32 %v4149_v14, %v4149_v14 }
 0x414   : > { %v4221_v13 = vadd.f32 %v2111_v33, %v2014_v24  ;;  %2655 = vmatmul.msk.bf16.gmra.mxu3 %vm708_vm9, %v1821_v41  ;;  %2696 = vmatmul.msk.bf16.gmra.mxu1 %vm708_vm9, %v1821_v41  ;;  %v2193_v33 = vsel %vm610_vm7, %v4157_v53, 0.0 }
 0x417   : > { %v1912_v63 = vpop.f32.mrf.mxu3 }
 0x419   : > { %v2112_v2 = vpop.f32.mrf.mxu1 }
 0x41a   : > { %v2113_v6 = vadd.f32 %v2112_v2, %v1909_v28  ;;  %v2019_v18 = vpop.f32.mrf.mxu0  ;;  %v2192_v2 = vsel %vm610_vm7, %v4149_v14, 0.0 }
 0x41c   : > { %v4225_v42 = vadd.f32 %v2113_v6, %v2016_v59  ;;  %v2264_v59 = vmul.f32 %v4161_v61, %v4161_v61 }
 0x41f   : > { %v1914_v60 = vpop.f32.mrf.mxu3 }
 0x421   : > { %v2115_v47 = vpop.f32.mrf.mxu1 }
 0x422   : > { %v2116_v36 = vadd.f32 %v2115_v47, %v1912_v63  ;;  %v2021_v23 = vpop.f32.mrf.mxu0  ;;  %v2194_v47 = vadd.f32 %v2193_v33, %v2192_v2 }
 0x424   : > { %v4227_v58 = vadd.f32 %v2116_v36, %v2019_v18  ;;  %2697 = vmatmul.msk.bf16.gmra.mxu1 %vm708_vm9, %v1823_v35  ;;  %v2263_v35 = vmul.f32 %v4157_v53, %v4157_v53  ;;  %v2195_v18 = vsel %vm610_vm7, %v4161_v61, 0.0 }
 0x426   : > { %v2295_v6 = vsel %vm610_vm7, %v2263_v35, 0.0  ;;  %v2203_v35 = vsel %vm610_vm7, %v4185_v25, 0.0 }
 0x427   : > { %v1917_v46 = vpop.f32.mrf.mxu3 }
 0x429   : > { %v2117_v45 = vpop.f32.mrf.mxu1 }
 0x42a   : > { %v2118_v8 = vadd.f32 %v2117_v45, %v1914_v60  ;;  %v2024_v57 = vpop.f32.mrf.mxu0  ;;  %v2265_v60 = vmul.f32 %v4169_v48, %v4169_v48  ;;  %v2197_v45 = vsel %vm610_vm7, %v4169_v48, 0.0 }
 0x42c   : > { %v4230_v5 = vadd.f32 %v2118_v8, %v2021_v23  ;;  %v2294_v23 = vsel %vm610_vm7, %v2262_v30, 0.0  ;;  %v2266_v8 = vmul.f32 %v4173_v21, %v4173_v21  ;;  %v2269_v30 = vmul.f32 %v4193_v10, %v4193_v10 }
 0x42f   : > { %v1919_v11 = vpop.f32.mrf.mxu3 }
 0x431   : > { %v2120_v20 = vpop.f32.mrf.mxu1 }
 0x432   : > { %v2121_v7 = vadd.f32 %v2120_v20, %v1917_v46  ;;  %v2026_v31 = vpop.f32.mrf.mxu0  ;;  %v2297_v46 = vsel %vm610_vm7, %v2264_v59, 0.0  ;;  %v2299_v20 = vsel %vm610_vm7, %v2265_v60, 0.0  ;;  %v2270_v60 = vmul.f32 %v4197_v15, %v4197_v15 }
 0x434   : > { %v4232_v12 = vadd.f32 %v2121_v7, %v2024_v57  ;;  %v2296_v57 = vadd.f32 %v2295_v6, %v2294_v23  ;;  %v2199_v7 = vsel %vm610_vm7, %v4173_v21, 0.0 }
 0x437   : > { %v1922_v50 = vpop.f32.mrf.mxu3 }
 0x439   : > { %v2122_v27 = vpop.f32.mrf.mxu1 }
 0x43a   : > { %v2123_v40 = vadd.f32 %v2122_v27, %v1919_v11  ;;  %v2029_v29 = vpop.f32.mrf.mxu0  ;;  %v2196_v11 = vadd.f32 %v2195_v18, %v2194_v47  ;;  %v2205_v18 = vsel %vm610_vm7, %v4193_v10, 0.0 }
 0x43c   : > { %v4234_v56 = vadd.f32 %v2123_v40, %v2026_v31  ;;  %v2267_v31 = vmul.f32 %v4182_v43, %v4182_v43  ;;  %v2198_v27 = vadd.f32 %v2197_v45, %v2196_v11  ;;  %v2301_v40 = vsel %vm610_vm7, %v2266_v8, 0.0 }
 0x43d   : > { %v2207_v45 = vsel %vm610_vm7, %v4197_v15, 0.0  ;;  %v2271_v8 = vmul.f32 %v4205_v51, %v4205_v51 }
 0x43f   : > { %v1924_v49 = vpop.f32.mrf.mxu3 }
 0x441   : > { %v2125_v9 = vpop.f32.mrf.mxu1 }
 0x442   : > { %v2126_v3 = vadd.f32 %v2125_v9, %v1922_v50  ;;  %v4236_v55 = vpop.f32.mrf.mxu0  ;;  %v2298_v50 = vadd.f32 %v2297_v46, %v2296_v57  ;;  %v2307_v46 = vsel %vm610_vm7, %v2269_v30, 0.0 }
 0x444   : > { %v4238_v22 = vadd.f32 %v2126_v3, %v2029_v29  ;;  %v2201_v29 = vsel %vm610_vm7, %v4182_v43, 0.0  ;;  %v2300_v3 = vadd.f32 %v2299_v20, %v2298_v50  ;;  %v2309_v20 = vsel %vm610_vm7, %v2270_v60, 0.0 }
 0x446   : > { %v2302_v33 = vadd.f32 %v2301_v40, %v2300_v3  ;;  %v2311_v40 = vsel %vm610_vm7, %v2271_v8, 0.0 }
 0x447   : > { %v1927_v37 = vpop.f32.mrf.mxu3 }
 0x449   : > { %v2127_v4 = vpop.f32.mrf.mxu1 }
 0x44a   : > { %v4240_v34 = vadd.f32 %v2127_v4, %v1924_v49  ;;  %v4242_v41 = vpop.f32.mrf.mxu0  ;;  %v2268_v49 = vmul.f32 %v4185_v25, %v4185_v25 }
 0x44c   : > { %v2305_v6 = vsel %vm610_vm7, %v2268_v49, 0.0  ;;  %v2273_v49 = vmul.f32 %v4218_v44, %v4218_v44 }
 0x44f   : > { %v4244_v52 = vpop.f32.mrf.mxu3 }
 0x451   : > { %v2130_v62 = vpop.f32.mrf.mxu1 }
 0x452   : > { %v4246_v19 = vadd.f32 %v2130_v62, %v1927_v37  ;;  %v4248_v54 = vpop.f32.mrf.mxu0  ;;  %v2200_v37 = vadd.f32 %v2199_v7, %v2198_v27  ;;  %v2303_v62 = vsel %vm610_vm7, %v2267_v31, 0.0  ;;  %v2209_v7 = vsel %vm610_vm7, %v4205_v51, 0.0 }
 0x453   : > { %v2304_v47 = vadd.f32 %v2303_v62, %v2302_v33  ;;  %v2272_v31 = vmul.f32 %v4209_v26, %v4209_v26 }
 0x454   : > { %v2202_v59 = vadd.f32 %v2201_v29, %v2200_v37  ;;  %v2211_v29 = vsel %vm610_vm7, %v4209_v26, 0.0 }
 0x455   : > { %v2306_v57 = vadd.f32 %v2305_v6, %v2304_v47  ;;  %v2313_v33 = vsel %vm610_vm7, %v2272_v31, 0.0  ;;  %v2274_v6 = vmul.f32 %v4221_v13, %v4221_v13  ;;  %v2315_v47 = vsel %vm610_vm7, %v2273_v49, 0.0 }
 0x456   : > { %v2204_v23 = vadd.f32 %v2203_v35, %v2202_v59  ;;  %v2213_v59 = vsel %vm610_vm7, %v4218_v44, 0.0 }
 0x457   : > { %v4250_v0 = vpop.f32.mrf.mxu3  ;;  %v2308_v50 = vadd.f32 %v2307_v46, %v2306_v57  ;;  %v2275_v46 = vmul.f32 %v4225_v42, %v4225_v42  ;;  %v2317_v57 = vsel %vm610_vm7, %v2274_v6, 0.0 }
 0x458   : > { %v2206_v11 = vadd.f32 %v2205_v18, %v2204_v23  ;;  %v2215_v23 = vsel %vm610_vm7, %v4221_v13, 0.0 }
 0x459   : > { %v4252_v1 = vpop.f32.mrf.mxu1  ;;  %v2310_v37 = vadd.f32 %v2309_v20, %v2308_v50  ;;  %v2276_v20 = vmul.f32 %v4227_v58, %v4227_v58  ;;  %v2277_v50 = vmul.f32 %v4230_v5, %v4230_v5 }
 0x45a   : > { %v4254_v17 = vpop.f32.mrf.mxu0  ;;  %v2208_v27 = vadd.f32 %v2207_v45, %v2206_v11  ;;  %v2217_v11 = vsel %vm610_vm7, %v4225_v42, 0.0 }
 0x45b   : > { %v2312_v18 = vadd.f32 %v2311_v40, %v2310_v37  ;;  %v2219_v40 = vsel %vm610_vm7, %v4227_v58, 0.0 }
 0x45c   : > { %v2210_v62 = vadd.f32 %v2209_v7, %v2208_v27  ;;  %v2319_v27 = vsel %vm610_vm7, %v2275_v46, 0.0  ;;  %v2223_v46 = vsel %vm610_vm7, %v4232_v12, 0.0 }
 0x45d   : > { %v2314_v45 = vadd.f32 %v2313_v33, %v2312_v18  ;;  %v2221_v33 = vsel %vm610_vm7, %v4230_v5, 0.0 }
 0x45e   : > { %v2212_v60 = vadd.f32 %v2211_v29, %v2210_v62  ;;  %v2321_v62 = vsel %vm610_vm7, %v2276_v20, 0.0 }
 0x45f   : > { %v4256_v39 = vpop.f32.mrf.mxu3  ;;  %v2316_v7 = vadd.f32 %v2315_v47, %v2314_v45  ;;  %v2279_v45 = vmul.f32 %v4234_v56, %v4234_v56 }
 0x460   : > { %v2214_v8 = vadd.f32 %v2213_v59, %v2212_v60  ;;  %v2278_v59 = vmul.f32 %v4232_v12, %v4232_v12  ;;  %v2323_v60 = vsel %vm610_vm7, %v2277_v50, 0.0  ;;  %v2225_v50 = vsel %vm610_vm7, %v4234_v56, 0.0 }
 0x461   : > { %v4258_v16 = vpop.f32.mrf.mxu1  ;;  %v2318_v29 = vadd.f32 %v2317_v57, %v2316_v7  ;;  %v2133_v57 = vadd.f32 %v4252_v1, %v4244_v52  ;;  %v2327_v1 = vsel %vm610_vm7, %v2279_v45, 0.0 }
 0x462   : > { %v4260_v32 = vpop.f32.mrf.mxu0  ;;  %v2216_v31 = vadd.f32 %v2215_v23, %v2214_v8  ;;  %v4374_v8 = vadd.f32 %v4240_v34, %v4236_v55  ;;  %v2136_v7 = vadd.f32 %v4258_v16, %v4250_v0  ;;  %v4387_v55 = vadd.f32 %v4246_v19, %v4242_v41 }
 0x463   : > { %v2320_v6 = vadd.f32 %v2319_v27, %v2318_v29  ;;  %v2280_v27 = vmul.f32 %v4238_v22, %v4238_v22  ;;  %v2227_v0 = vsel %vm610_vm7, %v4238_v22, 0.0  ;;  %v4397_v29 = vadd.f32 %v2133_v57, %v4248_v54 }
 0x464   : > { %v2218_v49 = vadd.f32 %v2217_v11, %v2216_v31  ;;  %v2325_v31 = vsel %vm610_vm7, %v2278_v59, 0.0  ;;  %v2281_v16 = vmul.f32 %v4374_v8, %v4374_v8  ;;  %v4400_v41 = vadd.f32 %v2136_v7, %v4254_v17 }
 0x465   : > { %v2322_v11 = vadd.f32 %v2321_v62, %v2320_v6  ;;  %v2233_v7 = vsel %vm610_vm7, %v4397_v29, 0.0 }
 0x466   : > { %v2220_v18 = vadd.f32 %v2219_v40, %v2218_v49  ;;  %v2331_v17 = vsel %vm610_vm7, %v2281_v16, 0.0 }
 0x467   : > { %v4262_v24 = vpop.f32.mrf.mxu3  ;;  %v2324_v34 = vadd.f32 %v2323_v60, %v2322_v11  ;;  %v2231_v60 = vsel %vm610_vm7, %v4387_v55, 0.0 }
 0x468   : > { %v2222_v20 = vadd.f32 %v2221_v33, %v2220_v18  ;;  %v2329_v33 = vsel %vm610_vm7, %v2280_v27, 0.0 }
 0x469   : > { %v4264_v38 = vpop.f32.mrf.mxu1  ;;  %v2326_v49 = vadd.f32 %v2325_v31, %v2324_v34 }
 0x46a   : > { %v4268_v28 = vpop.f32.mrf.mxu0  ;;  %v2224_v40 = vadd.f32 %v2223_v46, %v2222_v20  ;;  %v2138_v52 = vadd.f32 %v4264_v38, %v4256_v39  ;;  %v2229_v39 = vsel %vm610_vm7, %v4374_v8, 0.0  ;;  %v2282_v38 = vmul.f32 %v4387_v55, %v4387_v55 }
 0x46b   : > { %v2328_v6 = vadd.f32 %v2327_v1, %v2326_v49  ;;  %v2283_v46 = vmul.f32 %v4397_v29, %v4397_v29 }
 0x46c   : > { %v2226_v62 = vadd.f32 %v2225_v50, %v2224_v40  ;;  %v4410_v18 = vadd.f32 %v2138_v52, %v4260_v32  ;;  %v2333_v32 = vsel %vm610_vm7, %v2282_v38, 0.0  ;;  %v2235_v40 = vsel %vm610_vm7, %v4400_v41, 0.0 }
 0x46d   : > { %v2330_v57 = vadd.f32 %v2329_v33, %v2328_v6  ;;  %v2335_v34 = vsel %vm610_vm7, %v2283_v46, 0.0 }
 0x46e   : > { %v2228_v54 = vadd.f32 %v2227_v0, %v2226_v62 }
 0x46f   : > { %v4276_v63 = vpop.f32.mrf.mxu3  ;;  %v2332_v27 = vadd.f32 %v2331_v17, %v2330_v57 }
 0x470   : > { %v2230_v11 = vadd.f32 %v2229_v39, %v2228_v54 }
 0x471   : > { %v4285_v36 = vpop.f32.mrf.mxu1 }
 0x472   : > { %v4303_v9 = vpop.f32.mrf.mxu0  ;;  %v2141_v59 = vadd.f32 %v4285_v36, %v4262_v24  ;;  %v2284_v24 = vmul.f32 %v4400_v41, %v4400_v41 }
 0x474   : > { %v4425_v31 = vadd.f32 %v2141_v59, %v4268_v28  ;;  %v2334_v28 = vadd.f32 %v2333_v32, %v2332_v27  ;;  %v2337_v16 = vsel %vm610_vm7, %v2284_v24, 0.0 }
 0x476   : > { %v2286_v49 = vmul.f32 %v4425_v31, %v4425_v31  ;;  %v2336_v39 = vadd.f32 %v2335_v34, %v2334_v28 }
 0x477   : > { %v4305_v4 = vpop.f32.mrf.mxu3 }
 0x478   : > { %v2338_v54 = vadd.f32 %v2337_v16, %v2336_v39 }
 0x479   : > { %v4312_v2 = vpop.f32.mrf.mxu1 }
 0x47a   : > { %v4334_v3 = vpop.f32.mrf.mxu0  ;;  %v2143_v45 = vadd.f32 %v4312_v2, %v4276_v63  ;;  %v2232_v63 = vadd.f32 %v2231_v60, %v2230_v11  ;;  %v2285_v2 = vmul.f32 %v4410_v18, %v4410_v18 }
 0x47c   : > { %v4435_v52 = vadd.f32 %v2143_v45, %v4303_v9  ;;  %v2234_v0 = vadd.f32 %v2233_v7, %v2232_v63  ;;  %v2339_v38 = vsel %vm610_vm7, %v2285_v2, 0.0 }
 0x47d   : > { %v2340_v46 = vadd.f32 %v2339_v38, %v2338_v54 }
 0x47e   : > { %v2236_v9 = vadd.f32 %v2235_v40, %v2234_v0 }
 0x47f   : > { %v4336_v35 = vpop.f32.mrf.mxu3 }
 0x481   : > { %v4338_v30 = vpop.f32.mrf.mxu1 }
 0x482   : > { %v4366_v47 = vpop.f32.mrf.mxu0  ;;  %v2146_v50 = vadd.f32 %v4338_v30, %v4305_v4  ;;  %v2237_v30 = vsel %vm610_vm7, %v4410_v18, 0.0 }
 0x483   : > { %v2238_v17 = vadd.f32 %v2237_v30, %v2236_v9 }
 0x484   : > { %v4444_v62 = vadd.f32 %v2146_v50, %v4334_v3  ;;  %v2341_v3 = vsel %vm610_vm7, %v2286_v49, 0.0 }
 0x485   : > { %v2342_v7 = vadd.f32 %v2341_v3, %v2340_v46 }
 0x486   : > { %v2243_v24 = vsel %vm610_vm7, %v4444_v62, 0.0 }
 0x487   : > { %v1947_v23 = vpop.f32.mrf.mxu3 }
 0x489   : > { %v2147_v37 = vpop.f32.mrf.mxu1 }
 0x48a   : > { %v2054_v36 = vpop.f32.mrf.mxu0  ;;  %v2148_v1 = vadd.f32 %v2147_v37, %v4336_v35  ;;  %v2239_v35 = vsel %vm610_vm7, %v4425_v31, 0.0  ;;  %v2287_v37 = vmul.f32 %v4435_v52, %v4435_v52 }
 0x48b   : > { %v2240_v45 = vadd.f32 %v2239_v35, %v2238_v17 }
 0x48c   : > { %v4452_v59 = vadd.f32 %v2148_v1, %v4366_v47  ;;  %v2343_v47 = vsel %vm610_vm7, %v2287_v37, 0.0 }
 0x48d   : > { %v2344_v40 = vadd.f32 %v2343_v47, %v2342_v7 }
 0x48e   : > { %v2245_v63 = vsel %vm610_vm7, %v4452_v59, 0.0 }
 0x48f   : > { %v1949_v20 = vpop.f32.mrf.mxu3 }
 0x491   : > { %v2150_v19 = vpop.f32.mrf.mxu1 }
 0x492   : > { %v2151_v33 = vadd.f32 %v2150_v19, %v1947_v23  ;;  %v2241_v23 = vsel %vm610_vm7, %v4435_v52, 0.0  ;;  %v2288_v19 = vmul.f32 %v4444_v62, %v4444_v62  ;;  %v2056_v57 = vpop.f32.mrf.mxu0 }
 0x493   : > { %v2242_v50 = vadd.f32 %v2241_v23, %v2240_v45 }
 0x494   : > { %v4459_v60 = vadd.f32 %v2151_v33, %v2054_v36  ;;  %v2345_v36 = vsel %vm610_vm7, %v2288_v19, 0.0 }
 0x495   : > { %v2244_v1 = vadd.f32 %v2243_v24, %v2242_v50 }
 0x496   : > { %v2290_v2 = vmul.f32 %v4459_v60, %v4459_v60  ;;  %v2247_v0 = vsel %vm610_vm7, %v4459_v60, 0.0 }
 0x497   : > { %v1952_v11 = vpop.f32.mrf.mxu3  ;;  %v2246_v30 = vadd.f32 %v2245_v63, %v2244_v1 }
 0x498   : > { %v2349_v49 = vsel %vm610_vm7, %v2290_v2, 0.0 }
 0x499   : > { %v2152_v4 = vpop.f32.mrf.mxu1  ;;  %v2248_v38 = vadd.f32 %v2247_v0, %v2246_v30 }
 0x49a   : > { %v2153_v6 = vadd.f32 %v2152_v4, %v1949_v20  ;;  %v2289_v20 = vmul.f32 %v4452_v59, %v4452_v59  ;;  %v2346_v4 = vadd.f32 %v2345_v36, %v2344_v40 }
 0x49c   : > { %v4466_v32 = vadd.f32 %v2153_v6, %v2056_v57  ;;  %v2347_v28 = vsel %vm610_vm7, %v2289_v20, 0.0 }
 0x49d   : > { %v2348_v9 = vadd.f32 %v2347_v28, %v2346_v4 }
 0x49e   : > { %v2291_v16 = vmul.f32 %v4466_v32, %v4466_v32  ;;  %v2249_v33 = vsel %vm610_vm7, %v4466_v32, 0.0 }
 0x49f   : > { %v2350_v6 = vadd.f32 %v2349_v49, %v2348_v9  ;;  %v1954_v54 = vpop.f32.mrf.mxu3  ;;  %v2250_v17 = vadd.f32 %v2249_v33, %v2248_v38 }
 0x4a0   : > { %v2351_v35 = vsel %vm610_vm7, %v2291_v16, 0.0 }
 0x4a1   : > { %v2155_v27 = vpop.f32.mrf.mxu1  ;;  %v2352_v45 = vadd.f32 %v2351_v35, %v2350_v6 }
 0x4a2   : > { %v4473_v34 = vadd.f32 %v2155_v27, %v1952_v11 }
 0x4a4   : > { %v2292_v39 = vmul.f32 %v4473_v34, %v4473_v34  ;;  %v2251_v37 = vsel %vm610_vm7, %v4473_v34, 0.0 }
 0x4a5   : > { %v2252_v46 = vadd.f32 %v2251_v37, %v2250_v17 }
 0x4a6   : > { %v2353_v23 = vsel %vm610_vm7, %v2292_v39, 0.0 }
 0x4a7   : > { %v2354_v47 = vadd.f32 %v2353_v23, %v2352_v45 }
 0x4a9   : > { %v2157_v3 = vpop.f32.mrf.mxu1 }
 0x4aa   : > { %v4489_v19 = vadd.f32 %v2157_v3, %v1954_v54 }
 0x4ac   : > { %v2253_v57 = vsel %vm610_vm7, %v4489_v19, 0.0  ;;  %v2293_v11 = vmul.f32 %v4489_v19, %v4489_v19 }
 0x4ad   : > { %v2254_v24 = vadd.f32 %v2253_v57, %v2252_v46 }
 0x4ae   : > { %v2355_v20 = vsel %vm610_vm7, %v2293_v11, 0.0 }
 0x4af   : > { %v2255_v7 = vrot.slane %v2254_v24, 4  ;;  %v2356_v50 = vadd.f32 %v2355_v20, %v2354_v47 }
 0x4b1   : > { %v2256_v27 = vadd.f32 %v2255_v7, %v2254_v24  ;;  %v2357_v36 = vrot.slane %v2356_v50, 4 }
 0x4b3   : > { %v2257_v63 = vrot.slane %v2256_v27, 2  ;;  %v2358_v2 = vadd.f32 %v2357_v36, %v2356_v50  ;;  %v2726_v36 = vld [vmem:[%s2804_s17] sm:$0xff] }
 0x4b5   : > { %v2258_v40 = vadd.f32 %v2257_v63, %v2256_v27  ;;  %v2359_v1 = vrot.slane %v2358_v2, 2 }
 0x4b7   : > { %v2259_v28 = vrot.slane %v2258_v40, 1  ;;  %v2360_v0 = vadd.f32 %v2359_v1, %v2358_v2  ;;  %v2727_v2 = vld [vmem:[%s2804_s17 + $0x8] sm:$0xff]  ;;  %v2728_v1 = vld [vmem:[%s2804_s17 + $0x10] sm:$0xff] }
 0x4b9   : > { %v2260_v16 = vadd.f32 %v2259_v28, %v2258_v40  ;;  %v2361_v4 = vrot.slane %v2360_v0, 1 }
 0x4bb   : > { %v4496_v30 = vmul.f32 0.00390625, %v2260_v16  ;;  %v2362_v49 = vadd.f32 %v2361_v4, %v2360_v0 }
 0x4bd   : > { %v2363_v33 = vmul.f32 0.00390625, %v2362_v49  ;;  %v2364_v39 = vmul.f32 %v4496_v30, %v4496_v30  ;;  %v2367_v45 = vsub.f32 %v4149_v14, %v4496_v30  ;;  %v2368_v57 = vsub.f32 %v4157_v53, %v4496_v30 }
 0x4be   : > { %v2369_v11 = vsub.f32 %v4161_v61, %v4496_v30  ;;  %v2370_v47 = vsub.f32 %v4169_v48, %v4496_v30  ;;  %v2371_v24 = vsub.f32 %v4173_v21, %v4496_v30  ;;  %v2372_v53 = vsub.f32 %v4182_v43, %v4496_v30 }
 0x4bf   : > { %v2365_v9 = vsub.f32 %v2363_v33, %v2364_v39  ;;  %v2373_v61 = vsub.f32 %v4185_v25, %v4496_v30  ;;  %v2374_v21 = vsub.f32 %v4193_v10, %v4496_v30  ;;  %v2375_v43 = vsub.f32 %v4197_v15, %v4496_v30  ;;  %v2729_v15 = vld [vmem:[%s2804_s17 + $0x18] sm:$0xff]  ;;  %v2730_v33 = vld [vmem:[%s2804_s17 + $0x20] sm:$0xff] }
 0x4c0   : > { %v2376_v10 = vsub.f32 %v4205_v51, %v4496_v30  ;;  %v2377_v4 = vsub.f32 %v4209_v26, %v4496_v30  ;;  %v2378_v51 = vsub.f32 %v4218_v44, %v4496_v30  ;;  %v2379_v26 = vsub.f32 %v4221_v13, %v4496_v30 }
 0x4c1   : > { %v2366_v38 = vmax.f32 %v2365_v9, 0.0  ;;  %v2380_v44 = vsub.f32 %v4225_v42, %v4496_v30  ;;  %v2381_v13 = vsub.f32 %v4227_v58, %v4496_v30  ;;  %v2382_v42 = vsub.f32 %v4230_v5, %v4496_v30 }
 0x4c2   : > { %v2383_v58 = vsub.f32 %v4232_v12, %v4496_v30  ;;  %v2384_v5 = vsub.f32 %v4234_v56, %v4496_v30  ;;  %v2385_v12 = vsub.f32 %v4238_v22, %v4496_v30  ;;  %v2386_v56 = vsub.f32 %v4374_v8, %v4496_v30 }
 0x4c3   : > { %v2399_v35 = vadd.f32 1e-05, %v2366_v38  ;;  %v2731_v38 = vld [vmem:[%s2804_s17 + $0x28] sm:$0xff]  ;;  %v2387_v22 = vsub.f32 %v4387_v55, %v4496_v30  ;;  %v2388_v8 = vsub.f32 %v4397_v29, %v4496_v30  ;;  %v2389_v55 = vsub.f32 %v4400_v41, %v4496_v30 }
 0x4c4   : > { %v2390_v29 = vsub.f32 %v4410_v18, %v4496_v30  ;;  %v2391_v41 = vsub.f32 %v4425_v31, %v4496_v30  ;;  %v2392_v18 = vsub.f32 %v4435_v52, %v4496_v30  ;;  %v2393_v31 = vsub.f32 %v4444_v62, %v4496_v30 }
 0x4c5   : > { %2724 = vrsqrt.f32 %v2399_v35  ;;  %vm2406_vm14 = vweird.f32 %v2399_v35  ;;  %v2394_v52 = vsub.f32 %v4452_v59, %v4496_v30  ;;  %v2395_v62 = vsub.f32 %v4459_v60, %v4496_v30 }
 0x4c6   : > { %v2396_v59 = vsub.f32 %v4466_v32, %v4496_v30  ;;  %v2397_v60 = vsub.f32 %v4473_v34, %v4496_v30  ;;  %v2398_v32 = vsub.f32 %v4489_v19, %v4496_v30  ;;  %v2753_v30 = vld [vmem:[%s2804_s17 + $0xd8] sm:$0xff] }
 0x4cb   : > { %v2725_v37 = vpop.eup %2724 }
 0x4cc   : > { %v2401_v6 = vmul.f32 %v2725_v37, %v2399_v35  ;;  %vm2407_vm13 = vweird.f32 %v2725_v37 }
 0x4cd   : > { %vm2408_vm15 = vmor %vm2406_vm14, %vm2407_vm13 }
 0x4ce   : > { %v2402_v54 = vmul.f32 %v2725_v37, %v2401_v6  ;;  %v2732_v6 = vld [vmem:[%s2804_s17 + $0x30] sm:$0xff] }
 0x4d0   : > { %v2403_v17 = vmul.f32 0.5, %v2402_v54 }
 0x4d2   : > { %v2404_v3 = vsub.f32 1.5, %v2403_v17 }
 0x4d4   : > { %v2405_v23 = vmul.f32 %v2725_v37, %v2404_v3  ;;  %v2733_v3 = vld [vmem:[%s2804_s17 + $0x38] sm:$0xff] }
 0x4d6   : > { %v4500_v46 = vsel %vm2408_vm15, %v2725_v37, %v2405_v23 }
 0x4d7   : > { %v2410_v20 = vmul.f32 %v4500_v46, %v2367_v45  ;;  %v2411_v7 = vmul.f32 %v4500_v46, %v2368_v57  ;;  %v2412_v14 = vmul.f32 %v4500_v46, %v2369_v11  ;;  %v2413_v50 = vmul.f32 %v4500_v46, %v2370_v47  ;;  %v2734_v57 = vld [vmem:[%s2804_s17 + $0x40] sm:$0xff] }
 0x4d8   : > { %v2414_v48 = vmul.f32 %v4500_v46, %v2371_v24  ;;  %v2415_v27 = vmul.f32 %v4500_v46, %v2372_v53  ;;  %v2416_v25 = vmul.f32 %v4500_v46, %v2373_v61  ;;  %v2417_v0 = vmul.f32 %v4500_v46, %v2374_v21  ;;  %v2735_v24 = vld [vmem:[%s2804_s17 + $0x48] sm:$0xff]  ;;  %v2737_v61 = vld [vmem:[%s2804_s17 + $0x58] sm:$0xff] }
 0x4d9   : > { %v2442_v63 = vadd.f32 %v2726_v36, %v2410_v20  ;;  %v2443_v40 = vadd.f32 %v2727_v2, %v2411_v7  ;;  %v2444_v28 = vadd.f32 %v2728_v1, %v2412_v14  ;;  %v2445_v16 = vadd.f32 %v2729_v15, %v2413_v50  ;;  %v2736_v14 = vld [vmem:[%s2804_s17 + $0x50] sm:$0xff]  ;;  %v2739_v36 = vld [vmem:[%s2804_s17 + $0x68] sm:$0xff] }
 0x4da   : > { %v2418_v49 = vmul.f32 %v4500_v46, %v2375_v43  ;;  %v2446_v39 = vadd.f32 %v2730_v33, %v2414_v48  ;;  %v2419_v9 = vmul.f32 %v4500_v46, %v2376_v10  ;;  %v2447_v35 = vadd.f32 %v2731_v38, %v2415_v27  ;;  %v2738_v43 = vld [vmem:[%s2804_s17 + $0x60] sm:$0xff]  ;;  %v2741_v10 = vld [vmem:[%s2804_s17 + $0x78] sm:$0xff]  ;;  %v2743_v33 = vld [vmem:[%s2804_s17 + $0x88] sm:$0xff] }
 0x4db   : > { %2474 = vst.msk [vmem:[%s4526_s23] sm:$0xff] %vm610_vm7, %v2442_v63  ;;  %v2420_v37 = vmul.f32 %v4500_v46, %v2377_v4  ;;  %v2448_v54 = vadd.f32 %v2732_v6, %v2416_v25  ;;  %v2421_v17 = vmul.f32 %v4500_v46, %v2378_v51  ;;  %v2449_v23 = vadd.f32 %v2733_v3, %v2417_v0  ;;  %v2747_v3 = vld [vmem:[%s2804_s17 + $0xa8] sm:$0xff] }
 0x4dc   : > { %2475 = vst.msk [vmem:[%s4526_s23 + $0x8] sm:$0xff] %vm610_vm7, %v2443_v40  ;;  %v2422_v45 = vmul.f32 %v4500_v46, %v2379_v26  ;;  %v2450_v11 = vadd.f32 %v2734_v57, %v2418_v49  ;;  %v2423_v47 = vmul.f32 %v4500_v46, %v2380_v44  ;;  %v2451_v20 = vadd.f32 %v2735_v24, %v2419_v9  ;;  %v2740_v40 = vld [vmem:[%s2804_s17 + $0x70] sm:$0xff]  ;;  %v2745_v26 = vld [vmem:[%s2804_s17 + $0x98] sm:$0xff] }
 0x4dd   : > { %2476 = vst.msk [vmem:[%s4526_s23 + $0x10] sm:$0xff] %vm610_vm7, %v2444_v28  ;;  %v2424_v7 = vmul.f32 %v4500_v46, %v2381_v13  ;;  %v2452_v53 = vadd.f32 %v2736_v14, %v2420_v37  ;;  %v2425_v50 = vmul.f32 %v4500_v46, %v2382_v42  ;;  %v2453_v48 = vadd.f32 %v2737_v61, %v2421_v17  ;;  %v2744_v9 = vld [vmem:[%s2804_s17 + $0x90] sm:$0xff]  ;;  %v2749_v42 = vld [vmem:[%s2804_s17 + $0xb8] sm:$0xff]  ;;  %v2751_v14 = vld [vmem:[%s2804_s17 + $0xc8] sm:$0xff] }
 0x4de   : > { %2477 = vst.msk [vmem:[%s4526_s23 + $0x18] sm:$0xff] %vm610_vm7, %v2445_v16  ;;  %v2426_v21 = vmul.f32 %v4500_v46, %v2383_v58  ;;  %v2454_v27 = vadd.f32 %v2738_v43, %v2422_v45  ;;  %v2427_v25 = vmul.f32 %v4500_v46, %v2384_v5  ;;  %v2455_v63 = vadd.f32 %v2739_v36, %v2423_v47  ;;  %v2742_v16 = vld [vmem:[%s2804_s17 + $0x80] sm:$0xff]  ;;  %v2748_v45 = vld [vmem:[%s2804_s17 + $0xb0] sm:$0xff] }
 0x4df   : > { %2478 = vst.msk [vmem:[%s4526_s23 + $0x20] sm:$0xff] %vm610_vm7, %v2446_v39  ;;  %v2428_v2 = vmul.f32 %v4500_v46, %v2385_v12  ;;  %v2456_v1 = vadd.f32 %v2740_v40, %v2424_v7  ;;  %v2429_v28 = vmul.f32 %v4500_v46, %v2386_v56  ;;  %v2457_v0 = vadd.f32 %v2741_v10, %v2425_v50  ;;  %v2752_v5 = vld [vmem:[%s2804_s17 + $0xd0] sm:$0xff] }
 0x4e0   : > { %2479 = vst.msk [vmem:[%s4526_s23 + $0x28] sm:$0xff] %vm610_vm7, %v2447_v35  ;;  %v2430_v15 = vmul.f32 %v4500_v46, %v2387_v22  ;;  %v2458_v4 = vadd.f32 %v2742_v16, %v2426_v21  ;;  %v2431_v49 = vmul.f32 %v4500_v46, %v2388_v8  ;;  %v2459_v39 = vadd.f32 %v2743_v33, %v2427_v25  ;;  %v2755_v21 = vld [vmem:[%s2804_s17 + $0xe8] sm:$0xff] }
 0x4e1   : > { %2480 = vst.msk [vmem:[%s4526_s23 + $0x30] sm:$0xff] %vm610_vm7, %v2448_v54  ;;  %v2432_v51 = vmul.f32 %v4500_v46, %v2389_v55  ;;  %v2460_v38 = vadd.f32 %v2744_v9, %v2428_v2  ;;  %v2433_v35 = vmul.f32 %v4500_v46, %v2390_v29  ;;  %v2461_v37 = vadd.f32 %v2745_v26, %v2429_v28  ;;  %v2746_v54 = vld [vmem:[%s2804_s17 + $0xa0] sm:$0xff] }
 0x4e2   : > { %2481 = vst.msk [vmem:[%s4526_s23 + $0x38] sm:$0xff] %vm610_vm7, %v2449_v23  ;;  %v2434_v6 = vmul.f32 %v4500_v46, %v2391_v41  ;;  %v2462_v44 = vadd.f32 %v2746_v54, %v2430_v15  ;;  %v2435_v17 = vmul.f32 %v4500_v46, %v2392_v18  ;;  %v2463_v23 = vadd.f32 %v2747_v3, %v2431_v49 }
 0x4e3   : > { %2482 = vst.msk [vmem:[%s4526_s23 + $0x40] sm:$0xff] %vm610_vm7, %v2450_v11  ;;  %v2436_v13 = vmul.f32 %v4500_v46, %v2393_v31  ;;  %v2464_v57 = vadd.f32 %v2748_v45, %v2432_v51  ;;  %v2437_v11 = vmul.f32 %v4500_v46, %v2394_v52  ;;  %v2465_v47 = vadd.f32 %v2749_v42, %v2433_v35 }
 0x4e4   : > { %2483 = vst.msk [vmem:[%s4526_s23 + $0x48] sm:$0xff] %vm610_vm7, %v2451_v20  ;;  %v2438_v24 = vmul.f32 %v4500_v46, %v2395_v62  ;;  %v2750_v20 = vld [vmem:[%s2804_s17 + $0xc0] sm:$0xff]  ;;  %v2439_v7 = vmul.f32 %v4500_v46, %v2396_v59  ;;  %v2440_v34 = vmul.f32 %v4500_v46, %v2397_v60  ;;  %v2441_v19 = vmul.f32 %v4500_v46, %v2398_v32  ;;  %v2757_v46 = vld [vmem:[%s2804_s17 + $0xf8] sm:$0xff] }
 0x4e5   : > { %2484 = vst.msk [vmem:[%s4526_s23 + $0x50] sm:$0xff] %vm610_vm7, %v2452_v53  ;;  %v2466_v58 = vadd.f32 %v2750_v20, %v2434_v6  ;;  %v2467_v53 = vadd.f32 %v2751_v14, %v2435_v17  ;;  %v2468_v50 = vadd.f32 %v2752_v5, %v2436_v13  ;;  %v2469_v61 = vadd.f32 %v2753_v30, %v2437_v11 }
 0x4e6   : > { %2485 = vst.msk [vmem:[%s4526_s23 + $0x58] sm:$0xff] %vm610_vm7, %v2453_v48  ;;  %v2754_v48 = vld [vmem:[%s2804_s17 + $0xe0] sm:$0xff]  ;;  %v2471_v43 = vadd.f32 %v2755_v21, %v2439_v7  ;;  %v2473_v25 = vadd.f32 %v2757_v46, %v2441_v19 }
 0x4e7   : > { %2486 = vst.msk [vmem:[%s4526_s23 + $0x60] sm:$0xff] %vm610_vm7, %v2454_v27  ;;  %v2470_v12 = vadd.f32 %v2754_v48, %v2438_v24  ;;  %v2756_v27 = vld [vmem:[%s2804_s17 + $0xf0] sm:$0xff] }
 0x4e8   : > { %2487 = vst.msk [vmem:[%s4526_s23 + $0x68] sm:$0xff] %vm610_vm7, %v2455_v63  ;;  %v2472_v56 = vadd.f32 %v2756_v27, %v2440_v34 }
 0x4e9   : > { %2488 = vst.msk [vmem:[%s4526_s23 + $0x70] sm:$0xff] %vm610_vm7, %v2456_v1 }
 0x4ea   : > { %2489 = vst.msk [vmem:[%s4526_s23 + $0x78] sm:$0xff] %vm610_vm7, %v2457_v0 }
 0x4eb   : > { %2490 = vst.msk [vmem:[%s4526_s23 + $0x80] sm:$0xff] %vm610_vm7, %v2458_v4 }
 0x4ec   : > { %2491 = vst.msk [vmem:[%s4526_s23 + $0x88] sm:$0xff] %vm610_vm7, %v2459_v39 }
 0x4ed   : > { %2492 = vst.msk [vmem:[%s4526_s23 + $0x90] sm:$0xff] %vm610_vm7, %v2460_v38 }
 0x4ee   : > { %2493 = vst.msk [vmem:[%s4526_s23 + $0x98] sm:$0xff] %vm610_vm7, %v2461_v37 }
 0x4ef   : > { %2494 = vst.msk [vmem:[%s4526_s23 + $0xa0] sm:$0xff] %vm610_vm7, %v2462_v44 }
 0x4f0   : > { %2495 = vst.msk [vmem:[%s4526_s23 + $0xa8] sm:$0xff] %vm610_vm7, %v2463_v23 }
 0x4f1   : > { %2496 = vst.msk [vmem:[%s4526_s23 + $0xb0] sm:$0xff] %vm610_vm7, %v2464_v57 }
 0x4f2   : > { %2497 = vst.msk [vmem:[%s4526_s23 + $0xb8] sm:$0xff] %vm610_vm7, %v2465_v47 }
 0x4f3   : > { %2498 = vst.msk [vmem:[%s4526_s23 + $0xc0] sm:$0xff] %vm610_vm7, %v2466_v58 }
 0x4f4   : > { %2499 = vst.msk [vmem:[%s4526_s23 + $0xc8] sm:$0xff] %vm610_vm7, %v2467_v53 }
 0x4f5   : > { %2500 = vst.msk [vmem:[%s4526_s23 + $0xd0] sm:$0xff] %vm610_vm7, %v2468_v50 }
 0x4f6   : > { %2501 = vst.msk [vmem:[%s4526_s23 + $0xd8] sm:$0xff] %vm610_vm7, %v2469_v61 }
 0x4f7   : > { %2502 = vst.msk [vmem:[%s4526_s23 + $0xe0] sm:$0xff] %vm610_vm7, %v2470_v12 }
 0x4f8   : > { %2503 = vst.msk [vmem:[%s4526_s23 + $0xe8] sm:$0xff] %vm610_vm7, %v2471_v43 }
 0x4f9   : > { %2504 = vst.msk [vmem:[%s4526_s23 + $0xf0] sm:$0xff] %vm610_vm7, %v2472_v56 }
 0x4fa   : > { %2505 = vst.msk [vmem:[%s4526_s23 + $0xf8] sm:$0xff] %vm610_vm7, %v2473_v25 }
 0x4fb PF: > { %s13_s12 = sadd.s32 1, %s2764_s12  }
 0x4fc   : > { %p10_p4 = scmp.ge.s32.totalorder %s13_s12, 4  }
 0x4fe   :  { %12 = sbr.rel (!%p10_p4) target bundleno = 1 (0x1), region = 66 }

</bundles_post_ra>
